<compile_context>
chip_gen: v7x
topology: tpu7x:2x2x1
jax: 0.10.0
libtpu: 0.0.40
codegen_flags: <defaults>
</compile_context>

<pallas_src>
import math
import functools

import jax
import jax.numpy as jnp
from jax.experimental import pallas as pl
from jax.experimental.pallas import tpu as pltpu

# ---- config (mirrors the `args` dict fed to construct_transformer_student_model) ----
VOCAB = 100
MAX_POS = 32
TYPE_VOCAB = 2
NUM_LAYERS = 2            # args['num_hidden_layers']
NUM_HEADS = 4             # args['num_attention_heads']
HIDDEN = 32               # args['hidden_size']
INTERMEDIATE = 128        # BertConfig default is 3072; scaled down for small synthetic shapes
TEACHER_HIDDEN = 64       # args['teacher_hidden_size'] (> HIDDEN => hidden_linear used)
NUM_CLASSES = 3           # len(args['label_list'])
LN_EPS = 1e-12
HEAD_DIM = HIDDEN // NUM_HEADS
# args: distil_multi_hidden_states=True, distil_attention=False, do_NER=False


def _ceil8(x):
    return ((x + 7) // 8) * 8


# ---- bias/LN slab layout (one [SLAB_ROWS, 128] f32 array; static row indices) ----
SLAB_COLS = 128
ROWS_PER_LAYER = 8        # bqkv, bo, ln1_g, ln1_b, bi, bo2, ln2_g, ln2_b
ROW_EMB_LN_G = 0
ROW_EMB_LN_B = 1
ROW_LAYER0 = 2
ROW_HID_B = _ceil8(ROW_LAYER0 + NUM_LAYERS * ROWS_PER_LAYER)   # sublane-aligned block
ROW_LAST_B = ROW_HID_B + NUM_LAYERS + 1
SLAB_ROWS = _ceil8(ROW_LAST_B + 1)

_VMEM = functools.partial(pl.BlockSpec, memory_space=pltpu.MemorySpace.VMEM)


# ---------------------------------------------------------------------------
# Single fused kernel: LN(emb) -> L transformer layers -> batched CLS
# projections -> classifier logits.  Everything resident in VMEM/vregs.
# ---------------------------------------------------------------------------
def fused_student_kernel(emb_ref, mask_ref, wqkv_ref, wo_ref, wi_ref, wo2_ref,
                         hw_ref, lw_ref, slab_ref,
                         proj_ref, logits_ref,
                         *, num_layers, num_heads):
    BS, H = emb_ref.shape
    B, S = mask_ref.shape
    hd = H // num_heads
    I = wi_ref.shape[2]
    T = hw_ref.shape[2]
    C = lw_ref.shape[1]

    def row(r, width):                       # small-param slab lookup (static slice)
        return slab_ref[r, :width]

    def dense(v, w, b):
        return jnp.dot(v, w, preferred_element_type=jnp.float32) + b

    def ln(v, g, b):
        mu = jnp.mean(v, axis=-1, keepdims=True)
        var = jnp.mean(jnp.square(v - mu), axis=-1, keepdims=True)
        return (v - mu) * jax.lax.rsqrt(var + LN_EPS) * g + b

    # additive attention-mask bias, computed & broadcast ONCE (HF BERT uses -10000.0)
    bias3 = ((1.0 - mask_ref[...]) * -10000.0)[:, None, :]        # [B, 1, S]

    # --- BertEmbeddings LayerNorm (dropout = identity) ---
    h = ln(emb_ref[...], row(ROW_EMB_LN_G, H), row(ROW_EMB_LN_B, H))   # [B*S, H]
    cls_list = [h.reshape(B, S, H)[:, 0, :]]                      # hidden_states[0] CLS

    for l in range(num_layers):                                    # static unroll (L=2)
        base = ROW_LAYER0 + l * ROWS_PER_LAYER

        # --- self-attention: fused QKV projection (1/sqrt(hd) folded into wq/bq) ---
        qkv = dense(h, wqkv_ref[l], row(base + 0, 3 * H)).reshape(B, S, 3 * H)
        wo_l = wo_ref[l]                                           # [H, H]

        attn_out = jnp.zeros((BS, H), jnp.float32)
        for hh in range(num_heads):                                # static unroll; all vreg-resident
            qh = qkv[:, :, hh * hd:(hh + 1) * hd]
            kh = qkv[:, :, H + hh * hd:H + (hh + 1) * hd]
            vh = qkv[:, :, 2 * H + hh * hd:2 * H + (hh + 1) * hd]
            s = jnp.einsum('bqd,bkd->bqk', qh, kh,
                           preferred_element_type=jnp.float32) + bias3
            s = s - jnp.max(s, axis=-1, keepdims=True)
            p = jnp.exp(s)
            p = p * pl.reciprocal(jnp.sum(p, axis=-1, keepdims=True), approx=True)
            ctx_h = jnp.einsum('bqk,bkd->bqd', p, vh,
                               preferred_element_type=jnp.float32).reshape(BS, hd)
            # concat_h(ctx_h) @ Wo == sum_h ctx_h @ Wo[h*hd:(h+1)*hd, :]
            attn_out = attn_out + jnp.dot(ctx_h, wo_l[hh * hd:(hh + 1) * hd, :],
                                          preferred_element_type=jnp.float32)
        attn_out = attn_out + row(base + 1, H)
        h1 = ln(h + attn_out, row(base + 2, H), row(base + 3, H))  # post-LN (BERT)

        # --- feed forward (exact GELU) ---
        inter = dense(h1, wi_ref[l], row(base + 4, I))
        inter = 0.5 * inter * (1.0 + jax.lax.erf(inter * (1.0 / math.sqrt(2.0))))
        ffn = dense(inter, wo2_ref[l], row(base + 5, H))
        h = ln(h1 + ffn, row(base + 6, H), row(base + 7, H))

        cls_list.append(h.reshape(B, S, H)[:, 0, :])

    # embedding[i] = hidden_states[-(i+1)][:, 0] -> reverse collection order,
    # then project all (L+1) CLS vectors with one batched matmul.
    cls = jnp.stack(cls_list[::-1], axis=0)                        # [L+1, B, H]
    hb = slab_ref[ROW_HID_B:ROW_HID_B + num_layers + 1, :T]        # [L+1, T]
    proj = jnp.einsum('lbh,lht->lbt', cls, hw_ref[...],
                      preferred_element_type=jnp.float32) + hb[:, None, :]
    proj_ref[...] = proj

    # classifier head on embedding[0] (dropout = identity)
    logits_ref[...] = jnp.dot(proj[0], lw_ref[...],
                              preferred_element_type=jnp.float32) + row(ROW_LAST_B, C)


def _fused_call(emb2d, mask_f, p):
    B = mask_f.shape[0]
    kernel = functools.partial(fused_student_kernel,
                               num_layers=NUM_LAYERS, num_heads=NUM_HEADS)
    args = (emb2d, mask_f, p['wqkv'], p['wo'], p['wi'], p['wo2'],
            p['hid_w'], p['last_w'], p['slab'])
    proj, logits = pl.pallas_call(
        kernel,
        out_shape=(
            jax.ShapeDtypeStruct((NUM_LAYERS + 1, B, TEACHER_HIDDEN), jnp.float32),
            jax.ShapeDtypeStruct((B, NUM_CLASSES), jnp.float32),
        ),
        in_specs=[_VMEM()] * len(args),
        out_specs=(_VMEM(), _VMEM()),
    )(*args)
    return proj, logits


# ---------------------------------------------------------------------------
# One-time parameter packing (hoisted out of the per-call path): stack per-layer
# weights, fuse QKV, fold 1/sqrt(head_dim) into wq/bq, build the bias/LN slab.
# ---------------------------------------------------------------------------
def pack_params(params):
    scale = 1.0 / math.sqrt(HEAD_DIM)
    layers = params['layers']

    def stack(key):
        return jnp.stack([lp[key] for lp in layers], axis=0)

    wqkv = jnp.stack(
        [jnp.concatenate([lp['wq'] * scale, lp['wk'], lp['wv']], axis=1)
         for lp in layers], axis=0)                                # [L, H, 3H]

    slab = jnp.zeros((SLAB_ROWS, SLAB_COLS), jnp.float32)

    def put(s, r, v):
        v = jnp.asarray(v, jnp.float32).reshape(-1)
        return s.at[r, :v.shape[0]].set(v)

    slab = put(slab, ROW_EMB_LN_G, params['emb_ln_g'])
    slab = put(slab, ROW_EMB_LN_B, params['emb_ln_b'])
    for l, lp in enumerate(layers):
        base = ROW_LAYER0 + l * ROWS_PER_LAYER
        slab = put(slab, base + 0,
                   jnp.concatenate([lp['bq'] * scale, lp['bk'], lp['bv']]))
        slab = put(slab, base + 1, lp['bo'])
        slab = put(slab, base + 2, lp['ln1_g'])
        slab = put(slab, base + 3, lp['ln1_b'])
        slab = put(slab, base + 4, lp['bi'])
        slab = put(slab, base + 5, lp['bo2'])
        slab = put(slab, base + 6, lp['ln2_g'])
        slab = put(slab, base + 7, lp['ln2_b'])
    for i in range(NUM_LAYERS + 1):
        slab = put(slab, ROW_HID_B + i, params['hid_b'][i])
    slab = put(slab, ROW_LAST_B, params['last_b'])

    return dict(
        word_emb=params['word_emb'], pos_emb=params['pos_emb'],
        type_emb=params['type_emb'],
        wqkv=wqkv, wo=stack('wo'), wi=stack('wi'), wo2=stack('wo2'),
        hid_w=jnp.stack(params['hid_w'], axis=0),                  # [L+1, H, T]
        last_w=params['last_w'],                                   # [T, C]
        slab=slab,                                                 # [SLAB_ROWS, 128]
    )


# ---------------------------------------------------------------------------
# Jitted forward: embedding gathers (JAX glue) + the single fused kernel.
# Returns BOTH stage-1 projections and stage-2 logits from one call.
# ---------------------------------------------------------------------------
@jax.jit
def student_forward_jit(packed, input_ids, attention_mask, token_type_ids):
    B, S = input_ids.shape
    we = jnp.take(packed['word_emb'], input_ids, axis=0)           # [B,S,H]
    pe = packed['pos_emb'][:S][None, :, :]                         # [1,S,H]
    te = jnp.take(packed['type_emb'], token_type_ids, axis=0)      # [B,S,H]
    emb2d = (we + pe + te).astype(jnp.float32).reshape(B * S, HIDDEN)
    mask_f = attention_mask.astype(jnp.float32)
    proj, logits = _fused_call(emb2d, mask_f, packed)
    return proj, logits


def student_forward(packed, input_ids, attention_mask, token_type_ids, stage=2):
    proj, logits = student_forward_jit(packed, input_ids, attention_mask, token_type_ids)
    if stage == 1:
        # list of projected per-layer CLS embeddings (last layer first)
        return [proj[i] for i in range(NUM_LAYERS + 1)]
    return logits


# ---------------------------------------------------------------------------
# Deterministic parameter init (trunc-normal std=0.02 like BertConfig.initializer_range)
# ---------------------------------------------------------------------------
def init_params(key):
    keys = iter(jax.random.split(key, 64))

    def tn(shape, std=0.02):
        return jax.random.truncated_normal(next(keys), -2.0, 2.0, shape, jnp.float32) * std

    params = {}
    params['word_emb'] = tn((VOCAB, HIDDEN)).at[0].set(0.0)        # padding_idx=0
    params['pos_emb'] = tn((MAX_POS, HIDDEN))
    params['type_emb'] = tn((TYPE_VOCAB, HIDDEN))
    params['emb_ln_g'] = jnp.ones((HIDDEN,), jnp.float32)
    params['emb_ln_b'] = jnp.zeros((HIDDEN,), jnp.float32)

    layers = []
    for _ in range(NUM_LAYERS):
        layers.append(dict(
            wq=tn((HIDDEN, HIDDEN)), bq=jnp.zeros((HIDDEN,), jnp.float32),
            wk=tn((HIDDEN, HIDDEN)), bk=jnp.zeros((HIDDEN,), jnp.float32),
            wv=tn((HIDDEN, HIDDEN)), bv=jnp.zeros((HIDDEN,), jnp.float32),
            wo=tn((HIDDEN, HIDDEN)), bo=jnp.zeros((HIDDEN,), jnp.float32),
            ln1_g=jnp.ones((HIDDEN,), jnp.float32),
            ln1_b=jnp.zeros((HIDDEN,), jnp.float32),
            wi=tn((HIDDEN, INTERMEDIATE)), bi=jnp.zeros((INTERMEDIATE,), jnp.float32),
            wo2=tn((INTERMEDIATE, HIDDEN)), bo2=jnp.zeros((HIDDEN,), jnp.float32),
            ln2_g=jnp.ones((HIDDEN,), jnp.float32),
            ln2_b=jnp.zeros((HIDDEN,), jnp.float32),
        ))
    params['layers'] = layers

    params['hid_w'] = [tn((HIDDEN, TEACHER_HIDDEN)) for _ in range(NUM_LAYERS + 1)]
    params['hid_b'] = [jnp.zeros((TEACHER_HIDDEN,), jnp.float32)
                       for _ in range(NUM_LAYERS + 1)]
    params['last_w'] = tn((TEACHER_HIDDEN, NUM_CLASSES))
    params['last_b'] = jnp.zeros((NUM_CLASSES,), jnp.float32)
    return params


if __name__ == "__main__":
    key = jax.random.PRNGKey(0)
    pkey, ikey = jax.random.split(key, 2)
    params = init_params(pkey)
    packed = pack_params(params)          # pre-packed ONCE, reused every call

    B, S = 2, 8
    input_ids = jax.random.randint(ikey, (B, S), 1, VOCAB)
    attention_mask = jnp.ones((B, S), jnp.int32).at[1, 6:].set(0)
    token_type_ids = jnp.zeros((B, S), jnp.int32).at[:, 4:].set(1)

    # ONE jitted forward yields both stage-1 (per-layer CLS projections)
    # and stage-2 (classifier logits) outputs.
    proj, logits = student_forward_jit(packed, input_ids, attention_mask, token_type_ids)
    jax.block_until_ready((proj, logits))

    stage1 = [proj[i] for i in range(NUM_LAYERS + 1)]   # stage=1 return value
    assert len(stage1) == NUM_LAYERS + 1
    assert all(e.shape == (B, TEACHER_HIDDEN) for e in stage1)
    assert logits.shape == (B, NUM_CLASSES)
    assert bool(jnp.all(jnp.isfinite(proj)))
    assert bool(jnp.all(jnp.isfinite(logits)))
    print("KERNEL_OK")
</pallas_src>

<mosaic_0001>
module attributes {stable_mosaic.version = 11 : i64} {
  func.func @fused_student_kernel(%arg0: memref<16x32xf32, #tpu.memory_space<vmem>>, %arg1: memref<2x8xf32, #tpu.memory_space<vmem>>, %arg2: memref<2x32x96xf32, #tpu.memory_space<vmem>>, %arg3: memref<2x32x32xf32, #tpu.memory_space<vmem>>, %arg4: memref<2x32x128xf32, #tpu.memory_space<vmem>>, %arg5: memref<2x128x32xf32, #tpu.memory_space<vmem>>, %arg6: memref<3x32x64xf32, #tpu.memory_space<vmem>>, %arg7: memref<64x3xf32, #tpu.memory_space<vmem>>, %arg8: memref<32x128xf32, #tpu.memory_space<vmem>>, %arg9: memref<3x2x64xf32, #tpu.memory_space<vmem>>, %arg10: memref<2x3xf32, #tpu.memory_space<vmem>>) attributes {dimension_semantics = [], scalar_prefetch = 0 : i64, scratch_operands = 0 : i64, tpu.core_type = #tpu.core_type<tc>} {
    %c0 = arith.constant 0 : index
    %c0_0 = arith.constant 0 : index
    %0 = vector.load %arg1[%c0, %c0_0] : memref<2x8xf32, #tpu.memory_space<vmem>>, vector<2x8xf32>
    %cst = arith.constant 1.000000e+00 : f32
    %1 = vector.broadcast %cst : f32 to vector<2x8xf32>
    %2 = arith.subf %1, %0 : vector<2x8xf32>
    %cst_1 = arith.constant -1.000000e+04 : f32
    %3 = vector.broadcast %cst_1 : f32 to vector<2x8xf32>
    %4 = arith.mulf %2, %3 : vector<2x8xf32>
    %5 = vector.shape_cast %4 : vector<2x8xf32> to vector<2x1x8xf32>
    %c0_2 = arith.constant 0 : index
    %c0_3 = arith.constant 0 : index
    %6 = vector.load %arg0[%c0_2, %c0_3] : memref<16x32xf32, #tpu.memory_space<vmem>>, vector<16x32xf32>
    %c0_4 = arith.constant 0 : index
    %c0_5 = arith.constant 0 : index
    %7 = vector.load %arg8[%c0_4, %c0_5] : memref<32x128xf32, #tpu.memory_space<vmem>>, vector<1x32xf32>
    %8 = vector.shape_cast %7 : vector<1x32xf32> to vector<32xf32>
    %c1 = arith.constant 1 : index
    %c0_6 = arith.constant 0 : index
    %9 = vector.load %arg8[%c1, %c0_6] : memref<32x128xf32, #tpu.memory_space<vmem>>, vector<1x32xf32>
    %10 = vector.shape_cast %9 : vector<1x32xf32> to vector<32xf32>
    %cst_7 = arith.constant dense<0.000000e+00> : vector<16xf32>
    %11 = vector.multi_reduction <add>, %6, %cst_7 [1] : vector<16x32xf32> to vector<16xf32>
    %12 = vector.shape_cast %11 : vector<16xf32> to vector<16x1xf32>
    %cst_8 = arith.constant 3.200000e+01 : f32
    %13 = vector.broadcast %cst_8 : f32 to vector<16x1xf32>
    %14 = arith.divf %12, %13 : vector<16x1xf32>
    %15 = vector.broadcast %14 : vector<16x1xf32> to vector<16x32xf32>
    %16 = arith.subf %6, %15 : vector<16x32xf32>
    %17 = arith.mulf %16, %16 : vector<16x32xf32>
    %cst_9 = arith.constant dense<0.000000e+00> : vector<16xf32>
    %18 = vector.multi_reduction <add>, %17, %cst_9 [1] : vector<16x32xf32> to vector<16xf32>
    %19 = vector.shape_cast %18 : vector<16xf32> to vector<16x1xf32>
    %cst_10 = arith.constant 3.200000e+01 : f32
    %20 = vector.broadcast %cst_10 : f32 to vector<16x1xf32>
    %21 = arith.divf %19, %20 : vector<16x1xf32>
    %22 = vector.broadcast %14 : vector<16x1xf32> to vector<16x32xf32>
    %23 = arith.subf %6, %22 : vector<16x32xf32>
    %cst_11 = arith.constant 9.99999996E-13 : f32
    %24 = vector.broadcast %cst_11 : f32 to vector<16x1xf32>
    %25 = arith.addf %21, %24 : vector<16x1xf32>
    %26 = math.rsqrt %25 : vector<16x1xf32>
    %27 = vector.broadcast %26 : vector<16x1xf32> to vector<16x32xf32>
    %28 = arith.mulf %23, %27 : vector<16x32xf32>
    %29 = vector.shape_cast %8 : vector<32xf32> to vector<1x32xf32>
    %30 = vector.broadcast %29 : vector<1x32xf32> to vector<16x32xf32>
    %31 = arith.mulf %28, %30 : vector<16x32xf32>
    %32 = vector.shape_cast %10 : vector<32xf32> to vector<1x32xf32>
    %33 = vector.broadcast %32 : vector<1x32xf32> to vector<16x32xf32>
    %34 = arith.addf %31, %33 : vector<16x32xf32>
    %35 = vector.shape_cast %34 : vector<16x32xf32> to vector<2x8x32xf32>
    %36 = vector.extract_strided_slice %35 {offsets = [0, 0, 0], sizes = [2, 1, 32], strides = [1, 1, 1]} : vector<2x8x32xf32> to vector<2x1x32xf32>
    %37 = vector.shape_cast %36 : vector<2x1x32xf32> to vector<2x32xf32>
    %c0_12 = arith.constant 0 : index
    %c0_13 = arith.constant 0 : index
    %c0_14 = arith.constant 0 : index
    %38 = vector.load %arg2[%c0_12, %c0_13, %c0_14] : memref<2x32x96xf32, #tpu.memory_space<vmem>>, vector<1x32x96xf32>
    %39 = vector.shape_cast %38 : vector<1x32x96xf32> to vector<32x96xf32>
    %c2 = arith.constant 2 : index
    %c0_15 = arith.constant 0 : index
    %40 = vector.load %arg8[%c2, %c0_15] : memref<32x128xf32, #tpu.memory_space<vmem>>, vector<1x96xf32>
    %41 = vector.shape_cast %40 : vector<1x96xf32> to vector<96xf32>
    %cst_16 = arith.constant dense<0.000000e+00> : vector<16x96xf32>
    %42 = tpu.matmul %34, %39, %cst_16 {dimension_numbers = #tpu.dot_dimension_numbers<[1], [0], [0], [1], [0, 0, 1, 1], [], []>} : vector<16x32xf32>, vector<32x96xf32>, vector<16x96xf32> -> vector<16x96xf32>
    %43 = vector.shape_cast %41 : vector<96xf32> to vector<1x96xf32>
    %44 = vector.broadcast %43 : vector<1x96xf32> to vector<16x96xf32>
    %45 = arith.addf %42, %44 : vector<16x96xf32>
    %46 = vector.shape_cast %45 : vector<16x96xf32> to vector<2x8x96xf32>
    %c0_17 = arith.constant 0 : index
    %c0_18 = arith.constant 0 : index
    %c0_19 = arith.constant 0 : index
    %47 = vector.load %arg3[%c0_17, %c0_18, %c0_19] : memref<2x32x32xf32, #tpu.memory_space<vmem>>, vector<1x32x32xf32>
    %48 = vector.shape_cast %47 : vector<1x32x32xf32> to vector<32x32xf32>
    %cst_20 = arith.constant 0.000000e+00 : f32
    %49 = vector.broadcast %cst_20 : f32 to vector<16x32xf32>
    %50 = vector.extract_strided_slice %46 {offsets = [0, 0, 0], sizes = [2, 8, 8], strides = [1, 1, 1]} : vector<2x8x96xf32> to vector<2x8x8xf32>
    %51 = vector.extract_strided_slice %46 {offsets = [0, 0, 32], sizes = [2, 8, 8], strides = [1, 1, 1]} : vector<2x8x96xf32> to vector<2x8x8xf32>
    %52 = vector.extract_strided_slice %46 {offsets = [0, 0, 64], sizes = [2, 8, 8], strides = [1, 1, 1]} : vector<2x8x96xf32> to vector<2x8x8xf32>
    "tpu.trace_start"() <{level = 10 : i32, message = "bqd,bkd->bqk"}> : () -> ()
    %cst_21 = arith.constant dense<0.000000e+00> : vector<2x8x8xf32>
    %53 = tpu.matmul %50, %51, %cst_21 {dimension_numbers = #tpu.dot_dimension_numbers<[2], [2], [1], [1], [0, 0, 0, 1, 1, 1], [0], [0]>} : vector<2x8x8xf32>, vector<2x8x8xf32>, vector<2x8x8xf32> -> vector<2x8x8xf32>
    "tpu.trace_stop"() : () -> ()
    %54 = vector.broadcast %5 : vector<2x1x8xf32> to vector<2x8x8xf32>
    %55 = arith.addf %53, %54 : vector<2x8x8xf32>
    %cst_22 = arith.constant dense<0xFF800000> : vector<2x8xf32>
    %56 = vector.multi_reduction <maximumf>, %55, %cst_22 [2] : vector<2x8x8xf32> to vector<2x8xf32>
    %57 = vector.shape_cast %56 : vector<2x8xf32> to vector<2x8x1xf32>
    %58 = vector.broadcast %57 : vector<2x8x1xf32> to vector<2x8x8xf32>
    %59 = arith.subf %55, %58 : vector<2x8x8xf32>
    %60 = math.exp %59 : vector<2x8x8xf32>
    %cst_23 = arith.constant dense<0.000000e+00> : vector<2x8xf32>
    %61 = vector.multi_reduction <add>, %60, %cst_23 [2] : vector<2x8x8xf32> to vector<2x8xf32>
    %62 = vector.shape_cast %61 : vector<2x8xf32> to vector<2x8x1xf32>
    %63 = tpu.reciprocal %62 {approx = true} : vector<2x8x1xf32> -> vector<2x8x1xf32>
    %64 = vector.broadcast %63 : vector<2x8x1xf32> to vector<2x8x8xf32>
    %65 = arith.mulf %60, %64 : vector<2x8x8xf32>
    "tpu.trace_start"() <{level = 10 : i32, message = "bqk,bkd->bqd"}> : () -> ()
    %cst_24 = arith.constant dense<0.000000e+00> : vector<2x8x8xf32>
    %66 = tpu.matmul %65, %52, %cst_24 {dimension_numbers = #tpu.dot_dimension_numbers<[2], [1], [1], [2], [0, 0, 0, 1, 1, 2], [0], [0]>} : vector<2x8x8xf32>, vector<2x8x8xf32>, vector<2x8x8xf32> -> vector<2x8x8xf32>
    "tpu.trace_stop"() : () -> ()
    %67 = vector.shape_cast %66 : vector<2x8x8xf32> to vector<16x8xf32>
    %68 = vector.extract_strided_slice %48 {offsets = [0, 0], sizes = [8, 32], strides = [1, 1]} : vector<32x32xf32> to vector<8x32xf32>
    %cst_25 = arith.constant dense<0.000000e+00> : vector<16x32xf32>
    %69 = tpu.matmul %67, %68, %cst_25 {dimension_numbers = #tpu.dot_dimension_numbers<[1], [0], [0], [1], [0, 0, 1, 1], [], []>} : vector<16x8xf32>, vector<8x32xf32>, vector<16x32xf32> -> vector<16x32xf32>
    %70 = arith.addf %49, %69 : vector<16x32xf32>
    %71 = vector.extract_strided_slice %46 {offsets = [0, 0, 8], sizes = [2, 8, 8], strides = [1, 1, 1]} : vector<2x8x96xf32> to vector<2x8x8xf32>
    %72 = vector.extract_strided_slice %46 {offsets = [0, 0, 40], sizes = [2, 8, 8], strides = [1, 1, 1]} : vector<2x8x96xf32> to vector<2x8x8xf32>
    %73 = vector.extract_strided_slice %46 {offsets = [0, 0, 72], sizes = [2, 8, 8], strides = [1, 1, 1]} : vector<2x8x96xf32> to vector<2x8x8xf32>
    "tpu.trace_start"() <{level = 10 : i32, message = "bqd,bkd->bqk"}> : () -> ()
    %cst_26 = arith.constant dense<0.000000e+00> : vector<2x8x8xf32>
    %74 = tpu.matmul %71, %72, %cst_26 {dimension_numbers = #tpu.dot_dimension_numbers<[2], [2], [1], [1], [0, 0, 0, 1, 1, 1], [0], [0]>} : vector<2x8x8xf32>, vector<2x8x8xf32>, vector<2x8x8xf32> -> vector<2x8x8xf32>
    "tpu.trace_stop"() : () -> ()
    %75 = vector.broadcast %5 : vector<2x1x8xf32> to vector<2x8x8xf32>
    %76 = arith.addf %74, %75 : vector<2x8x8xf32>
    %cst_27 = arith.constant dense<0xFF800000> : vector<2x8xf32>
    %77 = vector.multi_reduction <maximumf>, %76, %cst_27 [2] : vector<2x8x8xf32> to vector<2x8xf32>
    %78 = vector.shape_cast %77 : vector<2x8xf32> to vector<2x8x1xf32>
    %79 = vector.broadcast %78 : vector<2x8x1xf32> to vector<2x8x8xf32>
    %80 = arith.subf %76, %79 : vector<2x8x8xf32>
    %81 = math.exp %80 : vector<2x8x8xf32>
    %cst_28 = arith.constant dense<0.000000e+00> : vector<2x8xf32>
    %82 = vector.multi_reduction <add>, %81, %cst_28 [2] : vector<2x8x8xf32> to vector<2x8xf32>
    %83 = vector.shape_cast %82 : vector<2x8xf32> to vector<2x8x1xf32>
    %84 = tpu.reciprocal %83 {approx = true} : vector<2x8x1xf32> -> vector<2x8x1xf32>
    %85 = vector.broadcast %84 : vector<2x8x1xf32> to vector<2x8x8xf32>
    %86 = arith.mulf %81, %85 : vector<2x8x8xf32>
    "tpu.trace_start"() <{level = 10 : i32, message = "bqk,bkd->bqd"}> : () -> ()
    %cst_29 = arith.constant dense<0.000000e+00> : vector<2x8x8xf32>
    %87 = tpu.matmul %86, %73, %cst_29 {dimension_numbers = #tpu.dot_dimension_numbers<[2], [1], [1], [2], [0, 0, 0, 1, 1, 2], [0], [0]>} : vector<2x8x8xf32>, vector<2x8x8xf32>, vector<2x8x8xf32> -> vector<2x8x8xf32>
    "tpu.trace_stop"() : () -> ()
    %88 = vector.shape_cast %87 : vector<2x8x8xf32> to vector<16x8xf32>
    %89 = vector.extract_strided_slice %48 {offsets = [8, 0], sizes = [8, 32], strides = [1, 1]} : vector<32x32xf32> to vector<8x32xf32>
    %cst_30 = arith.constant dense<0.000000e+00> : vector<16x32xf32>
    %90 = tpu.matmul %88, %89, %cst_30 {dimension_numbers = #tpu.dot_dimension_numbers<[1], [0], [0], [1], [0, 0, 1, 1], [], []>} : vector<16x8xf32>, vector<8x32xf32>, vector<16x32xf32> -> vector<16x32xf32>
    %91 = arith.addf %70, %90 : vector<16x32xf32>
    %92 = vector.extract_strided_slice %46 {offsets = [0, 0, 16], sizes = [2, 8, 8], strides = [1, 1, 1]} : vector<2x8x96xf32> to vector<2x8x8xf32>
    %93 = vector.extract_strided_slice %46 {offsets = [0, 0, 48], sizes = [2, 8, 8], strides = [1, 1, 1]} : vector<2x8x96xf32> to vector<2x8x8xf32>
    %94 = vector.extract_strided_slice %46 {offsets = [0, 0, 80], sizes = [2, 8, 8], strides = [1, 1, 1]} : vector<2x8x96xf32> to vector<2x8x8xf32>
    "tpu.trace_start"() <{level = 10 : i32, message = "bqd,bkd->bqk"}> : () -> ()
    %cst_31 = arith.constant dense<0.000000e+00> : vector<2x8x8xf32>
    %95 = tpu.matmul %92, %93, %cst_31 {dimension_numbers = #tpu.dot_dimension_numbers<[2], [2], [1], [1], [0, 0, 0, 1, 1, 1], [0], [0]>} : vector<2x8x8xf32>, vector<2x8x8xf32>, vector<2x8x8xf32> -> vector<2x8x8xf32>
    "tpu.trace_stop"() : () -> ()
    %96 = vector.broadcast %5 : vector<2x1x8xf32> to vector<2x8x8xf32>
    %97 = arith.addf %95, %96 : vector<2x8x8xf32>
    %cst_32 = arith.constant dense<0xFF800000> : vector<2x8xf32>
    %98 = vector.multi_reduction <maximumf>, %97, %cst_32 [2] : vector<2x8x8xf32> to vector<2x8xf32>
    %99 = vector.shape_cast %98 : vector<2x8xf32> to vector<2x8x1xf32>
    %100 = vector.broadcast %99 : vector<2x8x1xf32> to vector<2x8x8xf32>
    %101 = arith.subf %97, %100 : vector<2x8x8xf32>
    %102 = math.exp %101 : vector<2x8x8xf32>
    %cst_33 = arith.constant dense<0.000000e+00> : vector<2x8xf32>
    %103 = vector.multi_reduction <add>, %102, %cst_33 [2] : vector<2x8x8xf32> to vector<2x8xf32>
    %104 = vector.shape_cast %103 : vector<2x8xf32> to vector<2x8x1xf32>
    %105 = tpu.reciprocal %104 {approx = true} : vector<2x8x1xf32> -> vector<2x8x1xf32>
    %106 = vector.broadcast %105 : vector<2x8x1xf32> to vector<2x8x8xf32>
    %107 = arith.mulf %102, %106 : vector<2x8x8xf32>
    "tpu.trace_start"() <{level = 10 : i32, message = "bqk,bkd->bqd"}> : () -> ()
    %cst_34 = arith.constant dense<0.000000e+00> : vector<2x8x8xf32>
    %108 = tpu.matmul %107, %94, %cst_34 {dimension_numbers = #tpu.dot_dimension_numbers<[2], [1], [1], [2], [0, 0, 0, 1, 1, 2], [0], [0]>} : vector<2x8x8xf32>, vector<2x8x8xf32>, vector<2x8x8xf32> -> vector<2x8x8xf32>
    "tpu.trace_stop"() : () -> ()
    %109 = vector.shape_cast %108 : vector<2x8x8xf32> to vector<16x8xf32>
    %110 = vector.extract_strided_slice %48 {offsets = [16, 0], sizes = [8, 32], strides = [1, 1]} : vector<32x32xf32> to vector<8x32xf32>
    %cst_35 = arith.constant dense<0.000000e+00> : vector<16x32xf32>
    %111 = tpu.matmul %109, %110, %cst_35 {dimension_numbers = #tpu.dot_dimension_numbers<[1], [0], [0], [1], [0, 0, 1, 1], [], []>} : vector<16x8xf32>, vector<8x32xf32>, vector<16x32xf32> -> vector<16x32xf32>
    %112 = arith.addf %91, %111 : vector<16x32xf32>
    %113 = vector.extract_strided_slice %46 {offsets = [0, 0, 24], sizes = [2, 8, 8], strides = [1, 1, 1]} : vector<2x8x96xf32> to vector<2x8x8xf32>
    %114 = vector.extract_strided_slice %46 {offsets = [0, 0, 56], sizes = [2, 8, 8], strides = [1, 1, 1]} : vector<2x8x96xf32> to vector<2x8x8xf32>
    %115 = vector.extract_strided_slice %46 {offsets = [0, 0, 88], sizes = [2, 8, 8], strides = [1, 1, 1]} : vector<2x8x96xf32> to vector<2x8x8xf32>
    "tpu.trace_start"() <{level = 10 : i32, message = "bqd,bkd->bqk"}> : () -> ()
    %cst_36 = arith.constant dense<0.000000e+00> : vector<2x8x8xf32>
    %116 = tpu.matmul %113, %114, %cst_36 {dimension_numbers = #tpu.dot_dimension_numbers<[2], [2], [1], [1], [0, 0, 0, 1, 1, 1], [0], [0]>} : vector<2x8x8xf32>, vector<2x8x8xf32>, vector<2x8x8xf32> -> vector<2x8x8xf32>
    "tpu.trace_stop"() : () -> ()
    %117 = vector.broadcast %5 : vector<2x1x8xf32> to vector<2x8x8xf32>
    %118 = arith.addf %116, %117 : vector<2x8x8xf32>
    %cst_37 = arith.constant dense<0xFF800000> : vector<2x8xf32>
    %119 = vector.multi_reduction <maximumf>, %118, %cst_37 [2] : vector<2x8x8xf32> to vector<2x8xf32>
    %120 = vector.shape_cast %119 : vector<2x8xf32> to vector<2x8x1xf32>
    %121 = vector.broadcast %120 : vector<2x8x1xf32> to vector<2x8x8xf32>
    %122 = arith.subf %118, %121 : vector<2x8x8xf32>
    %123 = math.exp %122 : vector<2x8x8xf32>
    %cst_38 = arith.constant dense<0.000000e+00> : vector<2x8xf32>
    %124 = vector.multi_reduction <add>, %123, %cst_38 [2] : vector<2x8x8xf32> to vector<2x8xf32>
    %125 = vector.shape_cast %124 : vector<2x8xf32> to vector<2x8x1xf32>
    %126 = tpu.reciprocal %125 {approx = true} : vector<2x8x1xf32> -> vector<2x8x1xf32>
    %127 = vector.broadcast %126 : vector<2x8x1xf32> to vector<2x8x8xf32>
    %128 = arith.mulf %123, %127 : vector<2x8x8xf32>
    "tpu.trace_start"() <{level = 10 : i32, message = "bqk,bkd->bqd"}> : () -> ()
    %cst_39 = arith.constant dense<0.000000e+00> : vector<2x8x8xf32>
    %129 = tpu.matmul %128, %115, %cst_39 {dimension_numbers = #tpu.dot_dimension_numbers<[2], [1], [1], [2], [0, 0, 0, 1, 1, 2], [0], [0]>} : vector<2x8x8xf32>, vector<2x8x8xf32>, vector<2x8x8xf32> -> vector<2x8x8xf32>
    "tpu.trace_stop"() : () -> ()
    %130 = vector.shape_cast %129 : vector<2x8x8xf32> to vector<16x8xf32>
    %131 = vector.extract_strided_slice %48 {offsets = [24, 0], sizes = [8, 32], strides = [1, 1]} : vector<32x32xf32> to vector<8x32xf32>
    %cst_40 = arith.constant dense<0.000000e+00> : vector<16x32xf32>
    %132 = tpu.matmul %130, %131, %cst_40 {dimension_numbers = #tpu.dot_dimension_numbers<[1], [0], [0], [1], [0, 0, 1, 1], [], []>} : vector<16x8xf32>, vector<8x32xf32>, vector<16x32xf32> -> vector<16x32xf32>
    %133 = arith.addf %112, %132 : vector<16x32xf32>
    %c3 = arith.constant 3 : index
    %c0_41 = arith.constant 0 : index
    %134 = vector.load %arg8[%c3, %c0_41] : memref<32x128xf32, #tpu.memory_space<vmem>>, vector<1x32xf32>
    %135 = vector.shape_cast %134 : vector<1x32xf32> to vector<32xf32>
    %136 = vector.shape_cast %135 : vector<32xf32> to vector<1x32xf32>
    %137 = vector.broadcast %136 : vector<1x32xf32> to vector<16x32xf32>
    %138 = arith.addf %133, %137 : vector<16x32xf32>
    %139 = arith.addf %34, %138 : vector<16x32xf32>
    %c4 = arith.constant 4 : index
    %c0_42 = arith.constant 0 : index
    %140 = vector.load %arg8[%c4, %c0_42] : memref<32x128xf32, #tpu.memory_space<vmem>>, vector<1x32xf32>
    %141 = vector.shape_cast %140 : vector<1x32xf32> to vector<32xf32>
    %c5 = arith.constant 5 : index
    %c0_43 = arith.constant 0 : index
    %142 = vector.load %arg8[%c5, %c0_43] : memref<32x128xf32, #tpu.memory_space<vmem>>, vector<1x32xf32>
    %143 = vector.shape_cast %142 : vector<1x32xf32> to vector<32xf32>
    %cst_44 = arith.constant dense<0.000000e+00> : vector<16xf32>
    %144 = vector.multi_reduction <add>, %139, %cst_44 [1] : vector<16x32xf32> to vector<16xf32>
    %145 = vector.shape_cast %144 : vector<16xf32> to vector<16x1xf32>
    %cst_45 = arith.constant 3.200000e+01 : f32
    %146 = vector.broadcast %cst_45 : f32 to vector<16x1xf32>
    %147 = arith.divf %145, %146 : vector<16x1xf32>
    %148 = vector.broadcast %147 : vector<16x1xf32> to vector<16x32xf32>
    %149 = arith.subf %139, %148 : vector<16x32xf32>
    %150 = arith.mulf %149, %149 : vector<16x32xf32>
    %cst_46 = arith.constant dense<0.000000e+00> : vector<16xf32>
    %151 = vector.multi_reduction <add>, %150, %cst_46 [1] : vector<16x32xf32> to vector<16xf32>
    %152 = vector.shape_cast %151 : vector<16xf32> to vector<16x1xf32>
    %cst_47 = arith.constant 3.200000e+01 : f32
    %153 = vector.broadcast %cst_47 : f32 to vector<16x1xf32>
    %154 = arith.divf %152, %153 : vector<16x1xf32>
    %155 = vector.broadcast %147 : vector<16x1xf32> to vector<16x32xf32>
    %156 = arith.subf %139, %155 : vector<16x32xf32>
    %cst_48 = arith.constant 9.99999996E-13 : f32
    %157 = vector.broadcast %cst_48 : f32 to vector<16x1xf32>
    %158 = arith.addf %154, %157 : vector<16x1xf32>
    %159 = math.rsqrt %158 : vector<16x1xf32>
    %160 = vector.broadcast %159 : vector<16x1xf32> to vector<16x32xf32>
    %161 = arith.mulf %156, %160 : vector<16x32xf32>
    %162 = vector.shape_cast %141 : vector<32xf32> to vector<1x32xf32>
    %163 = vector.broadcast %162 : vector<1x32xf32> to vector<16x32xf32>
    %164 = arith.mulf %161, %163 : vector<16x32xf32>
    %165 = vector.shape_cast %143 : vector<32xf32> to vector<1x32xf32>
    %166 = vector.broadcast %165 : vector<1x32xf32> to vector<16x32xf32>
    %167 = arith.addf %164, %166 : vector<16x32xf32>
    %c0_49 = arith.constant 0 : index
    %c0_50 = arith.constant 0 : index
    %c0_51 = arith.constant 0 : index
    %168 = vector.load %arg4[%c0_49, %c0_50, %c0_51] : memref<2x32x128xf32, #tpu.memory_space<vmem>>, vector<1x32x128xf32>
    %169 = vector.shape_cast %168 : vector<1x32x128xf32> to vector<32x128xf32>
    %c6 = arith.constant 6 : index
    %c0_52 = arith.constant 0 : index
    %170 = vector.load %arg8[%c6, %c0_52] : memref<32x128xf32, #tpu.memory_space<vmem>>, vector<1x128xf32>
    %171 = vector.shape_cast %170 : vector<1x128xf32> to vector<128xf32>
    %cst_53 = arith.constant dense<0.000000e+00> : vector<16x128xf32>
    %172 = tpu.matmul %167, %169, %cst_53 {dimension_numbers = #tpu.dot_dimension_numbers<[1], [0], [0], [1], [0, 0, 1, 1], [], []>} : vector<16x32xf32>, vector<32x128xf32>, vector<16x128xf32> -> vector<16x128xf32>
    %173 = vector.shape_cast %171 : vector<128xf32> to vector<1x128xf32>
    %174 = vector.broadcast %173 : vector<1x128xf32> to vector<16x128xf32>
    %175 = arith.addf %172, %174 : vector<16x128xf32>
    %cst_54 = arith.constant 5.000000e-01 : f32
    %176 = vector.broadcast %cst_54 : f32 to vector<16x128xf32>
    %177 = arith.mulf %176, %175 : vector<16x128xf32>
    %cst_55 = arith.constant 0.707106769 : f32
    %178 = vector.broadcast %cst_55 : f32 to vector<16x128xf32>
    %179 = arith.mulf %175, %178 : vector<16x128xf32>
    %180 = math.erf %179 : vector<16x128xf32>
    %cst_56 = arith.constant 1.000000e+00 : f32
    %181 = vector.broadcast %cst_56 : f32 to vector<16x128xf32>
    %182 = arith.addf %181, %180 : vector<16x128xf32>
    %183 = arith.mulf %177, %182 : vector<16x128xf32>
    %c0_57 = arith.constant 0 : index
    %c0_58 = arith.constant 0 : index
    %c0_59 = arith.constant 0 : index
    %184 = vector.load %arg5[%c0_57, %c0_58, %c0_59] : memref<2x128x32xf32, #tpu.memory_space<vmem>>, vector<1x128x32xf32>
    %185 = vector.shape_cast %184 : vector<1x128x32xf32> to vector<128x32xf32>
    %c7 = arith.constant 7 : index
    %c0_60 = arith.constant 0 : index
    %186 = vector.load %arg8[%c7, %c0_60] : memref<32x128xf32, #tpu.memory_space<vmem>>, vector<1x32xf32>
    %187 = vector.shape_cast %186 : vector<1x32xf32> to vector<32xf32>
    %cst_61 = arith.constant dense<0.000000e+00> : vector<16x32xf32>
    %188 = tpu.matmul %183, %185, %cst_61 {dimension_numbers = #tpu.dot_dimension_numbers<[1], [0], [0], [1], [0, 0, 1, 1], [], []>} : vector<16x128xf32>, vector<128x32xf32>, vector<16x32xf32> -> vector<16x32xf32>
    %189 = vector.shape_cast %187 : vector<32xf32> to vector<1x32xf32>
    %190 = vector.broadcast %189 : vector<1x32xf32> to vector<16x32xf32>
    %191 = arith.addf %188, %190 : vector<16x32xf32>
    %192 = arith.addf %167, %191 : vector<16x32xf32>
    %c8 = arith.constant 8 : index
    %c0_62 = arith.constant 0 : index
    %193 = vector.load %arg8[%c8, %c0_62] : memref<32x128xf32, #tpu.memory_space<vmem>>, vector<1x32xf32>
    %194 = vector.shape_cast %193 : vector<1x32xf32> to vector<32xf32>
    %c9 = arith.constant 9 : index
    %c0_63 = arith.constant 0 : index
    %195 = vector.load %arg8[%c9, %c0_63] : memref<32x128xf32, #tpu.memory_space<vmem>>, vector<1x32xf32>
    %196 = vector.shape_cast %195 : vector<1x32xf32> to vector<32xf32>
    %cst_64 = arith.constant dense<0.000000e+00> : vector<16xf32>
    %197 = vector.multi_reduction <add>, %192, %cst_64 [1] : vector<16x32xf32> to vector<16xf32>
    %198 = vector.shape_cast %197 : vector<16xf32> to vector<16x1xf32>
    %cst_65 = arith.constant 3.200000e+01 : f32
    %199 = vector.broadcast %cst_65 : f32 to vector<16x1xf32>
    %200 = arith.divf %198, %199 : vector<16x1xf32>
    %201 = vector.broadcast %200 : vector<16x1xf32> to vector<16x32xf32>
    %202 = arith.subf %192, %201 : vector<16x32xf32>
    %203 = arith.mulf %202, %202 : vector<16x32xf32>
    %cst_66 = arith.constant dense<0.000000e+00> : vector<16xf32>
    %204 = vector.multi_reduction <add>, %203, %cst_66 [1] : vector<16x32xf32> to vector<16xf32>
    %205 = vector.shape_cast %204 : vector<16xf32> to vector<16x1xf32>
    %cst_67 = arith.constant 3.200000e+01 : f32
    %206 = vector.broadcast %cst_67 : f32 to vector<16x1xf32>
    %207 = arith.divf %205, %206 : vector<16x1xf32>
    %208 = vector.broadcast %200 : vector<16x1xf32> to vector<16x32xf32>
    %209 = arith.subf %192, %208 : vector<16x32xf32>
    %cst_68 = arith.constant 9.99999996E-13 : f32
    %210 = vector.broadcast %cst_68 : f32 to vector<16x1xf32>
    %211 = arith.addf %207, %210 : vector<16x1xf32>
    %212 = math.rsqrt %211 : vector<16x1xf32>
    %213 = vector.broadcast %212 : vector<16x1xf32> to vector<16x32xf32>
    %214 = arith.mulf %209, %213 : vector<16x32xf32>
    %215 = vector.shape_cast %194 : vector<32xf32> to vector<1x32xf32>
    %216 = vector.broadcast %215 : vector<1x32xf32> to vector<16x32xf32>
    %217 = arith.mulf %214, %216 : vector<16x32xf32>
    %218 = vector.shape_cast %196 : vector<32xf32> to vector<1x32xf32>
    %219 = vector.broadcast %218 : vector<1x32xf32> to vector<16x32xf32>
    %220 = arith.addf %217, %219 : vector<16x32xf32>
    %221 = vector.shape_cast %220 : vector<16x32xf32> to vector<2x8x32xf32>
    %222 = vector.extract_strided_slice %221 {offsets = [0, 0, 0], sizes = [2, 1, 32], strides = [1, 1, 1]} : vector<2x8x32xf32> to vector<2x1x32xf32>
    %223 = vector.shape_cast %222 : vector<2x1x32xf32> to vector<2x32xf32>
    %c1_69 = arith.constant 1 : index
    %c0_70 = arith.constant 0 : index
    %c0_71 = arith.constant 0 : index
    %224 = vector.load %arg2[%c1_69, %c0_70, %c0_71] : memref<2x32x96xf32, #tpu.memory_space<vmem>>, vector<1x32x96xf32>
    %225 = vector.shape_cast %224 : vector<1x32x96xf32> to vector<32x96xf32>
    %c10 = arith.constant 10 : index
    %c0_72 = arith.constant 0 : index
    %226 = vector.load %arg8[%c10, %c0_72] : memref<32x128xf32, #tpu.memory_space<vmem>>, vector<1x96xf32>
    %227 = vector.shape_cast %226 : vector<1x96xf32> to vector<96xf32>
    %cst_73 = arith.constant dense<0.000000e+00> : vector<16x96xf32>
    %228 = tpu.matmul %220, %225, %cst_73 {dimension_numbers = #tpu.dot_dimension_numbers<[1], [0], [0], [1], [0, 0, 1, 1], [], []>} : vector<16x32xf32>, vector<32x96xf32>, vector<16x96xf32> -> vector<16x96xf32>
    %229 = vector.shape_cast %227 : vector<96xf32> to vector<1x96xf32>
    %230 = vector.broadcast %229 : vector<1x96xf32> to vector<16x96xf32>
    %231 = arith.addf %228, %230 : vector<16x96xf32>
    %232 = vector.shape_cast %231 : vector<16x96xf32> to vector<2x8x96xf32>
    %c1_74 = arith.constant 1 : index
    %c0_75 = arith.constant 0 : index
    %c0_76 = arith.constant 0 : index
    %233 = vector.load %arg3[%c1_74, %c0_75, %c0_76] : memref<2x32x32xf32, #tpu.memory_space<vmem>>, vector<1x32x32xf32>
    %234 = vector.shape_cast %233 : vector<1x32x32xf32> to vector<32x32xf32>
    %cst_77 = arith.constant 0.000000e+00 : f32
    %235 = vector.broadcast %cst_77 : f32 to vector<16x32xf32>
    %236 = vector.extract_strided_slice %232 {offsets = [0, 0, 0], sizes = [2, 8, 8], strides = [1, 1, 1]} : vector<2x8x96xf32> to vector<2x8x8xf32>
    %237 = vector.extract_strided_slice %232 {offsets = [0, 0, 32], sizes = [2, 8, 8], strides = [1, 1, 1]} : vector<2x8x96xf32> to vector<2x8x8xf32>
    %238 = vector.extract_strided_slice %232 {offsets = [0, 0, 64], sizes = [2, 8, 8], strides = [1, 1, 1]} : vector<2x8x96xf32> to vector<2x8x8xf32>
    "tpu.trace_start"() <{level = 10 : i32, message = "bqd,bkd->bqk"}> : () -> ()
    %cst_78 = arith.constant dense<0.000000e+00> : vector<2x8x8xf32>
    %239 = tpu.matmul %236, %237, %cst_78 {dimension_numbers = #tpu.dot_dimension_numbers<[2], [2], [1], [1], [0, 0, 0, 1, 1, 1], [0], [0]>} : vector<2x8x8xf32>, vector<2x8x8xf32>, vector<2x8x8xf32> -> vector<2x8x8xf32>
    "tpu.trace_stop"() : () -> ()
    %240 = vector.broadcast %5 : vector<2x1x8xf32> to vector<2x8x8xf32>
    %241 = arith.addf %239, %240 : vector<2x8x8xf32>
    %cst_79 = arith.constant dense<0xFF800000> : vector<2x8xf32>
    %242 = vector.multi_reduction <maximumf>, %241, %cst_79 [2] : vector<2x8x8xf32> to vector<2x8xf32>
    %243 = vector.shape_cast %242 : vector<2x8xf32> to vector<2x8x1xf32>
    %244 = vector.broadcast %243 : vector<2x8x1xf32> to vector<2x8x8xf32>
    %245 = arith.subf %241, %244 : vector<2x8x8xf32>
    %246 = math.exp %245 : vector<2x8x8xf32>
    %cst_80 = arith.constant dense<0.000000e+00> : vector<2x8xf32>
    %247 = vector.multi_reduction <add>, %246, %cst_80 [2] : vector<2x8x8xf32> to vector<2x8xf32>
    %248 = vector.shape_cast %247 : vector<2x8xf32> to vector<2x8x1xf32>
    %249 = tpu.reciprocal %248 {approx = true} : vector<2x8x1xf32> -> vector<2x8x1xf32>
    %250 = vector.broadcast %249 : vector<2x8x1xf32> to vector<2x8x8xf32>
    %251 = arith.mulf %246, %250 : vector<2x8x8xf32>
    "tpu.trace_start"() <{level = 10 : i32, message = "bqk,bkd->bqd"}> : () -> ()
    %cst_81 = arith.constant dense<0.000000e+00> : vector<2x8x8xf32>
    %252 = tpu.matmul %251, %238, %cst_81 {dimension_numbers = #tpu.dot_dimension_numbers<[2], [1], [1], [2], [0, 0, 0, 1, 1, 2], [0], [0]>} : vector<2x8x8xf32>, vector<2x8x8xf32>, vector<2x8x8xf32> -> vector<2x8x8xf32>
    "tpu.trace_stop"() : () -> ()
    %253 = vector.shape_cast %252 : vector<2x8x8xf32> to vector<16x8xf32>
    %254 = vector.extract_strided_slice %234 {offsets = [0, 0], sizes = [8, 32], strides = [1, 1]} : vector<32x32xf32> to vector<8x32xf32>
    %cst_82 = arith.constant dense<0.000000e+00> : vector<16x32xf32>
    %255 = tpu.matmul %253, %254, %cst_82 {dimension_numbers = #tpu.dot_dimension_numbers<[1], [0], [0], [1], [0, 0, 1, 1], [], []>} : vector<16x8xf32>, vector<8x32xf32>, vector<16x32xf32> -> vector<16x32xf32>
    %256 = arith.addf %235, %255 : vector<16x32xf32>
    %257 = vector.extract_strided_slice %232 {offsets = [0, 0, 8], sizes = [2, 8, 8], strides = [1, 1, 1]} : vector<2x8x96xf32> to vector<2x8x8xf32>
    %258 = vector.extract_strided_slice %232 {offsets = [0, 0, 40], sizes = [2, 8, 8], strides = [1, 1, 1]} : vector<2x8x96xf32> to vector<2x8x8xf32>
    %259 = vector.extract_strided_slice %232 {offsets = [0, 0, 72], sizes = [2, 8, 8], strides = [1, 1, 1]} : vector<2x8x96xf32> to vector<2x8x8xf32>
    "tpu.trace_start"() <{level = 10 : i32, message = "bqd,bkd->bqk"}> : () -> ()
    %cst_83 = arith.constant dense<0.000000e+00> : vector<2x8x8xf32>
    %260 = tpu.matmul %257, %258, %cst_83 {dimension_numbers = #tpu.dot_dimension_numbers<[2], [2], [1], [1], [0, 0, 0, 1, 1, 1], [0], [0]>} : vector<2x8x8xf32>, vector<2x8x8xf32>, vector<2x8x8xf32> -> vector<2x8x8xf32>
    "tpu.trace_stop"() : () -> ()
    %261 = vector.broadcast %5 : vector<2x1x8xf32> to vector<2x8x8xf32>
    %262 = arith.addf %260, %261 : vector<2x8x8xf32>
    %cst_84 = arith.constant dense<0xFF800000> : vector<2x8xf32>
    %263 = vector.multi_reduction <maximumf>, %262, %cst_84 [2] : vector<2x8x8xf32> to vector<2x8xf32>
    %264 = vector.shape_cast %263 : vector<2x8xf32> to vector<2x8x1xf32>
    %265 = vector.broadcast %264 : vector<2x8x1xf32> to vector<2x8x8xf32>
    %266 = arith.subf %262, %265 : vector<2x8x8xf32>
    %267 = math.exp %266 : vector<2x8x8xf32>
    %cst_85 = arith.constant dense<0.000000e+00> : vector<2x8xf32>
    %268 = vector.multi_reduction <add>, %267, %cst_85 [2] : vector<2x8x8xf32> to vector<2x8xf32>
    %269 = vector.shape_cast %268 : vector<2x8xf32> to vector<2x8x1xf32>
    %270 = tpu.reciprocal %269 {approx = true} : vector<2x8x1xf32> -> vector<2x8x1xf32>
    %271 = vector.broadcast %270 : vector<2x8x1xf32> to vector<2x8x8xf32>
    %272 = arith.mulf %267, %271 : vector<2x8x8xf32>
    "tpu.trace_start"() <{level = 10 : i32, message = "bqk,bkd->bqd"}> : () -> ()
    %cst_86 = arith.constant dense<0.000000e+00> : vector<2x8x8xf32>
    %273 = tpu.matmul %272, %259, %cst_86 {dimension_numbers = #tpu.dot_dimension_numbers<[2], [1], [1], [2], [0, 0, 0, 1, 1, 2], [0], [0]>} : vector<2x8x8xf32>, vector<2x8x8xf32>, vector<2x8x8xf32> -> vector<2x8x8xf32>
    "tpu.trace_stop"() : () -> ()
    %274 = vector.shape_cast %273 : vector<2x8x8xf32> to vector<16x8xf32>
    %275 = vector.extract_strided_slice %234 {offsets = [8, 0], sizes = [8, 32], strides = [1, 1]} : vector<32x32xf32> to vector<8x32xf32>
    %cst_87 = arith.constant dense<0.000000e+00> : vector<16x32xf32>
    %276 = tpu.matmul %274, %275, %cst_87 {dimension_numbers = #tpu.dot_dimension_numbers<[1], [0], [0], [1], [0, 0, 1, 1], [], []>} : vector<16x8xf32>, vector<8x32xf32>, vector<16x32xf32> -> vector<16x32xf32>
    %277 = arith.addf %256, %276 : vector<16x32xf32>
    %278 = vector.extract_strided_slice %232 {offsets = [0, 0, 16], sizes = [2, 8, 8], strides = [1, 1, 1]} : vector<2x8x96xf32> to vector<2x8x8xf32>
    %279 = vector.extract_strided_slice %232 {offsets = [0, 0, 48], sizes = [2, 8, 8], strides = [1, 1, 1]} : vector<2x8x96xf32> to vector<2x8x8xf32>
    %280 = vector.extract_strided_slice %232 {offsets = [0, 0, 80], sizes = [2, 8, 8], strides = [1, 1, 1]} : vector<2x8x96xf32> to vector<2x8x8xf32>
    "tpu.trace_start"() <{level = 10 : i32, message = "bqd,bkd->bqk"}> : () -> ()
    %cst_88 = arith.constant dense<0.000000e+00> : vector<2x8x8xf32>
    %281 = tpu.matmul %278, %279, %cst_88 {dimension_numbers = #tpu.dot_dimension_numbers<[2], [2], [1], [1], [0, 0, 0, 1, 1, 1], [0], [0]>} : vector<2x8x8xf32>, vector<2x8x8xf32>, vector<2x8x8xf32> -> vector<2x8x8xf32>
    "tpu.trace_stop"() : () -> ()
    %282 = vector.broadcast %5 : vector<2x1x8xf32> to vector<2x8x8xf32>
    %283 = arith.addf %281, %282 : vector<2x8x8xf32>
    %cst_89 = arith.constant dense<0xFF800000> : vector<2x8xf32>
    %284 = vector.multi_reduction <maximumf>, %283, %cst_89 [2] : vector<2x8x8xf32> to vector<2x8xf32>
    %285 = vector.shape_cast %284 : vector<2x8xf32> to vector<2x8x1xf32>
    %286 = vector.broadcast %285 : vector<2x8x1xf32> to vector<2x8x8xf32>
    %287 = arith.subf %283, %286 : vector<2x8x8xf32>
    %288 = math.exp %287 : vector<2x8x8xf32>
    %cst_90 = arith.constant dense<0.000000e+00> : vector<2x8xf32>
    %289 = vector.multi_reduction <add>, %288, %cst_90 [2] : vector<2x8x8xf32> to vector<2x8xf32>
    %290 = vector.shape_cast %289 : vector<2x8xf32> to vector<2x8x1xf32>
    %291 = tpu.reciprocal %290 {approx = true} : vector<2x8x1xf32> -> vector<2x8x1xf32>
    %292 = vector.broadcast %291 : vector<2x8x1xf32> to vector<2x8x8xf32>
    %293 = arith.mulf %288, %292 : vector<2x8x8xf32>
    "tpu.trace_start"() <{level = 10 : i32, message = "bqk,bkd->bqd"}> : () -> ()
    %cst_91 = arith.constant dense<0.000000e+00> : vector<2x8x8xf32>
    %294 = tpu.matmul %293, %280, %cst_91 {dimension_numbers = #tpu.dot_dimension_numbers<[2], [1], [1], [2], [0, 0, 0, 1, 1, 2], [0], [0]>} : vector<2x8x8xf32>, vector<2x8x8xf32>, vector<2x8x8xf32> -> vector<2x8x8xf32>
    "tpu.trace_stop"() : () -> ()
    %295 = vector.shape_cast %294 : vector<2x8x8xf32> to vector<16x8xf32>
    %296 = vector.extract_strided_slice %234 {offsets = [16, 0], sizes = [8, 32], strides = [1, 1]} : vector<32x32xf32> to vector<8x32xf32>
    %cst_92 = arith.constant dense<0.000000e+00> : vector<16x32xf32>
    %297 = tpu.matmul %295, %296, %cst_92 {dimension_numbers = #tpu.dot_dimension_numbers<[1], [0], [0], [1], [0, 0, 1, 1], [], []>} : vector<16x8xf32>, vector<8x32xf32>, vector<16x32xf32> -> vector<16x32xf32>
    %298 = arith.addf %277, %297 : vector<16x32xf32>
    %299 = vector.extract_strided_slice %232 {offsets = [0, 0, 24], sizes = [2, 8, 8], strides = [1, 1, 1]} : vector<2x8x96xf32> to vector<2x8x8xf32>
    %300 = vector.extract_strided_slice %232 {offsets = [0, 0, 56], sizes = [2, 8, 8], strides = [1, 1, 1]} : vector<2x8x96xf32> to vector<2x8x8xf32>
    %301 = vector.extract_strided_slice %232 {offsets = [0, 0, 88], sizes = [2, 8, 8], strides = [1, 1, 1]} : vector<2x8x96xf32> to vector<2x8x8xf32>
    "tpu.trace_start"() <{level = 10 : i32, message = "bqd,bkd->bqk"}> : () -> ()
    %cst_93 = arith.constant dense<0.000000e+00> : vector<2x8x8xf32>
    %302 = tpu.matmul %299, %300, %cst_93 {dimension_numbers = #tpu.dot_dimension_numbers<[2], [2], [1], [1], [0, 0, 0, 1, 1, 1], [0], [0]>} : vector<2x8x8xf32>, vector<2x8x8xf32>, vector<2x8x8xf32> -> vector<2x8x8xf32>
    "tpu.trace_stop"() : () -> ()
    %303 = vector.broadcast %5 : vector<2x1x8xf32> to vector<2x8x8xf32>
    %304 = arith.addf %302, %303 : vector<2x8x8xf32>
    %cst_94 = arith.constant dense<0xFF800000> : vector<2x8xf32>
    %305 = vector.multi_reduction <maximumf>, %304, %cst_94 [2] : vector<2x8x8xf32> to vector<2x8xf32>
    %306 = vector.shape_cast %305 : vector<2x8xf32> to vector<2x8x1xf32>
    %307 = vector.broadcast %306 : vector<2x8x1xf32> to vector<2x8x8xf32>
    %308 = arith.subf %304, %307 : vector<2x8x8xf32>
    %309 = math.exp %308 : vector<2x8x8xf32>
    %cst_95 = arith.constant dense<0.000000e+00> : vector<2x8xf32>
    %310 = vector.multi_reduction <add>, %309, %cst_95 [2] : vector<2x8x8xf32> to vector<2x8xf32>
    %311 = vector.shape_cast %310 : vector<2x8xf32> to vector<2x8x1xf32>
    %312 = tpu.reciprocal %311 {approx = true} : vector<2x8x1xf32> -> vector<2x8x1xf32>
    %313 = vector.broadcast %312 : vector<2x8x1xf32> to vector<2x8x8xf32>
    %314 = arith.mulf %309, %313 : vector<2x8x8xf32>
    "tpu.trace_start"() <{level = 10 : i32, message = "bqk,bkd->bqd"}> : () -> ()
    %cst_96 = arith.constant dense<0.000000e+00> : vector<2x8x8xf32>
    %315 = tpu.matmul %314, %301, %cst_96 {dimension_numbers = #tpu.dot_dimension_numbers<[2], [1], [1], [2], [0, 0, 0, 1, 1, 2], [0], [0]>} : vector<2x8x8xf32>, vector<2x8x8xf32>, vector<2x8x8xf32> -> vector<2x8x8xf32>
    "tpu.trace_stop"() : () -> ()
    %316 = vector.shape_cast %315 : vector<2x8x8xf32> to vector<16x8xf32>
    %317 = vector.extract_strided_slice %234 {offsets = [24, 0], sizes = [8, 32], strides = [1, 1]} : vector<32x32xf32> to vector<8x32xf32>
    %cst_97 = arith.constant dense<0.000000e+00> : vector<16x32xf32>
    %318 = tpu.matmul %316, %317, %cst_97 {dimension_numbers = #tpu.dot_dimension_numbers<[1], [0], [0], [1], [0, 0, 1, 1], [], []>} : vector<16x8xf32>, vector<8x32xf32>, vector<16x32xf32> -> vector<16x32xf32>
    %319 = arith.addf %298, %318 : vector<16x32xf32>
    %c11 = arith.constant 11 : index
    %c0_98 = arith.constant 0 : index
    %320 = vector.load %arg8[%c11, %c0_98] : memref<32x128xf32, #tpu.memory_space<vmem>>, vector<1x32xf32>
    %321 = vector.shape_cast %320 : vector<1x32xf32> to vector<32xf32>
    %322 = vector.shape_cast %321 : vector<32xf32> to vector<1x32xf32>
    %323 = vector.broadcast %322 : vector<1x32xf32> to vector<16x32xf32>
    %324 = arith.addf %319, %323 : vector<16x32xf32>
    %325 = arith.addf %220, %324 : vector<16x32xf32>
    %c12 = arith.constant 12 : index
    %c0_99 = arith.constant 0 : index
    %326 = vector.load %arg8[%c12, %c0_99] : memref<32x128xf32, #tpu.memory_space<vmem>>, vector<1x32xf32>
    %327 = vector.shape_cast %326 : vector<1x32xf32> to vector<32xf32>
    %c13 = arith.constant 13 : index
    %c0_100 = arith.constant 0 : index
    %328 = vector.load %arg8[%c13, %c0_100] : memref<32x128xf32, #tpu.memory_space<vmem>>, vector<1x32xf32>
    %329 = vector.shape_cast %328 : vector<1x32xf32> to vector<32xf32>
    %cst_101 = arith.constant dense<0.000000e+00> : vector<16xf32>
    %330 = vector.multi_reduction <add>, %325, %cst_101 [1] : vector<16x32xf32> to vector<16xf32>
    %331 = vector.shape_cast %330 : vector<16xf32> to vector<16x1xf32>
    %cst_102 = arith.constant 3.200000e+01 : f32
    %332 = vector.broadcast %cst_102 : f32 to vector<16x1xf32>
    %333 = arith.divf %331, %332 : vector<16x1xf32>
    %334 = vector.broadcast %333 : vector<16x1xf32> to vector<16x32xf32>
    %335 = arith.subf %325, %334 : vector<16x32xf32>
    %336 = arith.mulf %335, %335 : vector<16x32xf32>
    %cst_103 = arith.constant dense<0.000000e+00> : vector<16xf32>
    %337 = vector.multi_reduction <add>, %336, %cst_103 [1] : vector<16x32xf32> to vector<16xf32>
    %338 = vector.shape_cast %337 : vector<16xf32> to vector<16x1xf32>
    %cst_104 = arith.constant 3.200000e+01 : f32
    %339 = vector.broadcast %cst_104 : f32 to vector<16x1xf32>
    %340 = arith.divf %338, %339 : vector<16x1xf32>
    %341 = vector.broadcast %333 : vector<16x1xf32> to vector<16x32xf32>
    %342 = arith.subf %325, %341 : vector<16x32xf32>
    %cst_105 = arith.constant 9.99999996E-13 : f32
    %343 = vector.broadcast %cst_105 : f32 to vector<16x1xf32>
    %344 = arith.addf %340, %343 : vector<16x1xf32>
    %345 = math.rsqrt %344 : vector<16x1xf32>
    %346 = vector.broadcast %345 : vector<16x1xf32> to vector<16x32xf32>
    %347 = arith.mulf %342, %346 : vector<16x32xf32>
    %348 = vector.shape_cast %327 : vector<32xf32> to vector<1x32xf32>
    %349 = vector.broadcast %348 : vector<1x32xf32> to vector<16x32xf32>
    %350 = arith.mulf %347, %349 : vector<16x32xf32>
    %351 = vector.shape_cast %329 : vector<32xf32> to vector<1x32xf32>
    %352 = vector.broadcast %351 : vector<1x32xf32> to vector<16x32xf32>
    %353 = arith.addf %350, %352 : vector<16x32xf32>
    %c1_106 = arith.constant 1 : index
    %c0_107 = arith.constant 0 : index
    %c0_108 = arith.constant 0 : index
    %354 = vector.load %arg4[%c1_106, %c0_107, %c0_108] : memref<2x32x128xf32, #tpu.memory_space<vmem>>, vector<1x32x128xf32>
    %355 = vector.shape_cast %354 : vector<1x32x128xf32> to vector<32x128xf32>
    %c14 = arith.constant 14 : index
    %c0_109 = arith.constant 0 : index
    %356 = vector.load %arg8[%c14, %c0_109] : memref<32x128xf32, #tpu.memory_space<vmem>>, vector<1x128xf32>
    %357 = vector.shape_cast %356 : vector<1x128xf32> to vector<128xf32>
    %cst_110 = arith.constant dense<0.000000e+00> : vector<16x128xf32>
    %358 = tpu.matmul %353, %355, %cst_110 {dimension_numbers = #tpu.dot_dimension_numbers<[1], [0], [0], [1], [0, 0, 1, 1], [], []>} : vector<16x32xf32>, vector<32x128xf32>, vector<16x128xf32> -> vector<16x128xf32>
    %359 = vector.shape_cast %357 : vector<128xf32> to vector<1x128xf32>
    %360 = vector.broadcast %359 : vector<1x128xf32> to vector<16x128xf32>
    %361 = arith.addf %358, %360 : vector<16x128xf32>
    %cst_111 = arith.constant 5.000000e-01 : f32
    %362 = vector.broadcast %cst_111 : f32 to vector<16x128xf32>
    %363 = arith.mulf %362, %361 : vector<16x128xf32>
    %cst_112 = arith.constant 0.707106769 : f32
    %364 = vector.broadcast %cst_112 : f32 to vector<16x128xf32>
    %365 = arith.mulf %361, %364 : vector<16x128xf32>
    %366 = math.erf %365 : vector<16x128xf32>
    %cst_113 = arith.constant 1.000000e+00 : f32
    %367 = vector.broadcast %cst_113 : f32 to vector<16x128xf32>
    %368 = arith.addf %367, %366 : vector<16x128xf32>
    %369 = arith.mulf %363, %368 : vector<16x128xf32>
    %c1_114 = arith.constant 1 : index
    %c0_115 = arith.constant 0 : index
    %c0_116 = arith.constant 0 : index
    %370 = vector.load %arg5[%c1_114, %c0_115, %c0_116] : memref<2x128x32xf32, #tpu.memory_space<vmem>>, vector<1x128x32xf32>
    %371 = vector.shape_cast %370 : vector<1x128x32xf32> to vector<128x32xf32>
    %c15 = arith.constant 15 : index
    %c0_117 = arith.constant 0 : index
    %372 = vector.load %arg8[%c15, %c0_117] : memref<32x128xf32, #tpu.memory_space<vmem>>, vector<1x32xf32>
    %373 = vector.shape_cast %372 : vector<1x32xf32> to vector<32xf32>
    %cst_118 = arith.constant dense<0.000000e+00> : vector<16x32xf32>
    %374 = tpu.matmul %369, %371, %cst_118 {dimension_numbers = #tpu.dot_dimension_numbers<[1], [0], [0], [1], [0, 0, 1, 1], [], []>} : vector<16x128xf32>, vector<128x32xf32>, vector<16x32xf32> -> vector<16x32xf32>
    %375 = vector.shape_cast %373 : vector<32xf32> to vector<1x32xf32>
    %376 = vector.broadcast %375 : vector<1x32xf32> to vector<16x32xf32>
    %377 = arith.addf %374, %376 : vector<16x32xf32>
    %378 = arith.addf %353, %377 : vector<16x32xf32>
    %c16 = arith.constant 16 : index
    %c0_119 = arith.constant 0 : index
    %379 = vector.load %arg8[%c16, %c0_119] : memref<32x128xf32, #tpu.memory_space<vmem>>, vector<1x32xf32>
    %380 = vector.shape_cast %379 : vector<1x32xf32> to vector<32xf32>
    %c17 = arith.constant 17 : index
    %c0_120 = arith.constant 0 : index
    %381 = vector.load %arg8[%c17, %c0_120] : memref<32x128xf32, #tpu.memory_space<vmem>>, vector<1x32xf32>
    %382 = vector.shape_cast %381 : vector<1x32xf32> to vector<32xf32>
    %cst_121 = arith.constant dense<0.000000e+00> : vector<16xf32>
    %383 = vector.multi_reduction <add>, %378, %cst_121 [1] : vector<16x32xf32> to vector<16xf32>
    %384 = vector.shape_cast %383 : vector<16xf32> to vector<16x1xf32>
    %cst_122 = arith.constant 3.200000e+01 : f32
    %385 = vector.broadcast %cst_122 : f32 to vector<16x1xf32>
    %386 = arith.divf %384, %385 : vector<16x1xf32>
    %387 = vector.broadcast %386 : vector<16x1xf32> to vector<16x32xf32>
    %388 = arith.subf %378, %387 : vector<16x32xf32>
    %389 = arith.mulf %388, %388 : vector<16x32xf32>
    %cst_123 = arith.constant dense<0.000000e+00> : vector<16xf32>
    %390 = vector.multi_reduction <add>, %389, %cst_123 [1] : vector<16x32xf32> to vector<16xf32>
    %391 = vector.shape_cast %390 : vector<16xf32> to vector<16x1xf32>
    %cst_124 = arith.constant 3.200000e+01 : f32
    %392 = vector.broadcast %cst_124 : f32 to vector<16x1xf32>
    %393 = arith.divf %391, %392 : vector<16x1xf32>
    %394 = vector.broadcast %386 : vector<16x1xf32> to vector<16x32xf32>
    %395 = arith.subf %378, %394 : vector<16x32xf32>
    %cst_125 = arith.constant 9.99999996E-13 : f32
    %396 = vector.broadcast %cst_125 : f32 to vector<16x1xf32>
    %397 = arith.addf %393, %396 : vector<16x1xf32>
    %398 = math.rsqrt %397 : vector<16x1xf32>
    %399 = vector.broadcast %398 : vector<16x1xf32> to vector<16x32xf32>
    %400 = arith.mulf %395, %399 : vector<16x32xf32>
    %401 = vector.shape_cast %380 : vector<32xf32> to vector<1x32xf32>
    %402 = vector.broadcast %401 : vector<1x32xf32> to vector<16x32xf32>
    %403 = arith.mulf %400, %402 : vector<16x32xf32>
    %404 = vector.shape_cast %382 : vector<32xf32> to vector<1x32xf32>
    %405 = vector.broadcast %404 : vector<1x32xf32> to vector<16x32xf32>
    %406 = arith.addf %403, %405 : vector<16x32xf32>
    %407 = vector.shape_cast %406 : vector<16x32xf32> to vector<2x8x32xf32>
    %408 = vector.extract_strided_slice %407 {offsets = [0, 0, 0], sizes = [2, 1, 32], strides = [1, 1, 1]} : vector<2x8x32xf32> to vector<2x1x32xf32>
    %409 = vector.shape_cast %408 : vector<2x1x32xf32> to vector<2x32xf32>
    %410 = vector.shape_cast %409 : vector<2x32xf32> to vector<1x2x32xf32>
    %411 = vector.shape_cast %223 : vector<2x32xf32> to vector<1x2x32xf32>
    %412 = vector.shape_cast %37 : vector<2x32xf32> to vector<1x2x32xf32>
    %413 = tpu.concatenate %410, %411, %412 in 0 : vector<1x2x32xf32>, vector<1x2x32xf32>, vector<1x2x32xf32> -> vector<3x2x32xf32>
    %c24 = arith.constant 24 : index
    %c0_126 = arith.constant 0 : index
    %414 = vector.load %arg8[%c24, %c0_126] : memref<32x128xf32, #tpu.memory_space<vmem>>, vector<3x64xf32>
    %c0_127 = arith.constant 0 : index
    %c0_128 = arith.constant 0 : index
    %c0_129 = arith.constant 0 : index
    %415 = vector.load %arg6[%c0_127, %c0_128, %c0_129] : memref<3x32x64xf32, #tpu.memory_space<vmem>>, vector<3x32x64xf32>
    "tpu.trace_start"() <{level = 10 : i32, message = "lbh,lht->lbt"}> : () -> ()
    %cst_130 = arith.constant dense<0.000000e+00> : vector<3x2x64xf32>
    %416 = tpu.matmul %413, %415, %cst_130 {dimension_numbers = #tpu.dot_dimension_numbers<[2], [1], [1], [2], [0, 0, 0, 1, 1, 2], [0], [0]>} : vector<3x2x32xf32>, vector<3x32x64xf32>, vector<3x2x64xf32> -> vector<3x2x64xf32>
    "tpu.trace_stop"() : () -> ()
    %417 = vector.shape_cast %414 : vector<3x64xf32> to vector<3x1x64xf32>
    %418 = vector.broadcast %417 : vector<3x1x64xf32> to vector<3x2x64xf32>
    %419 = arith.addf %416, %418 : vector<3x2x64xf32>
    %c0_131 = arith.constant 0 : index
    %c0_132 = arith.constant 0 : index
    %c0_133 = arith.constant 0 : index
    %420 = vector.load %arg9[%c0_131, %c0_132, %c0_133] : memref<3x2x64xf32, #tpu.memory_space<vmem>>, vector<3x2x64xf32>
    tpu.vector_store %arg9[%c0_131, %c0_132, %c0_133], %419 {strides = array<i32>} : memref<3x2x64xf32, #tpu.memory_space<vmem>>, vector<3x2x64xf32>,
    %421 = vector.extract_strided_slice %419 {offsets = [0, 0, 0], sizes = [1, 2, 64], strides = [1, 1, 1]} : vector<3x2x64xf32> to vector<1x2x64xf32>
    %422 = vector.shape_cast %421 : vector<1x2x64xf32> to vector<2x64xf32>
    %c0_134 = arith.constant 0 : index
    %c0_135 = arith.constant 0 : index
    %423 = vector.load %arg7[%c0_134, %c0_135] : memref<64x3xf32, #tpu.memory_space<vmem>>, vector<64x3xf32>
    %cst_136 = arith.constant dense<0.000000e+00> : vector<2x3xf32>
    %424 = tpu.matmul %422, %423, %cst_136 {dimension_numbers = #tpu.dot_dimension_numbers<[1], [0], [0], [1], [0, 0, 1, 1], [], []>} : vector<2x64xf32>, vector<64x3xf32>, vector<2x3xf32> -> vector<2x3xf32>
    %c27 = arith.constant 27 : index
    %c0_137 = arith.constant 0 : index
    %425 = vector.load %arg8[%c27, %c0_137] : memref<32x128xf32, #tpu.memory_space<vmem>>, vector<1x3xf32>
    %426 = vector.shape_cast %425 : vector<1x3xf32> to vector<3xf32>
    %427 = vector.shape_cast %426 : vector<3xf32> to vector<1x3xf32>
    %428 = vector.broadcast %427 : vector<1x3xf32> to vector<2x3xf32>
    %429 = arith.addf %424, %428 : vector<2x3xf32>
    %c0_138 = arith.constant 0 : index
    %c0_139 = arith.constant 0 : index
    %430 = vector.load %arg10[%c0_138, %c0_139] : memref<2x3xf32, #tpu.memory_space<vmem>>, vector<2x3xf32>
    tpu.vector_store %arg10[%c0_138, %c0_139], %429 {strides = array<i32>} : memref<2x3xf32, #tpu.memory_space<vmem>>, vector<2x3xf32>,
    return
  }
}

</mosaic_0001>

<bundles_post_ra>
// kernel: student_forward_jit.1
= control target key start
LH: loop header
LB: loop body
LE: loop exit
PB: predicated region body
PF: predicated region fallthrough
CT: control target
= control target key end

     0   :  { %16 = vsyncpa [#allocation3], 0  ;;  %vm66_vm0 = vcmask 261120   ;;  %s6342_s0 = inlined_call_operand.vmem [shape: f32[16,32], index: 0, kind: input, shape index: {}]   ;;  %s6343_s1 = inlined_call_operand.vmem [shape: f32[2,8], index: 1, kind: input, shape index: {}]   ;;  %s6344_s2 = inlined_call_operand.vmem [shape: f32[2,32,96], index: 2, kind: input, shape index: {}]   ;;  %s6345_s3 = inlined_call_operand.vmem [shape: f32[2,32,32], index: 3, kind: input, shape index: {}]   ;;  %s6346_s4 = inlined_call_operand.vmem [shape: f32[2,32,128], index: 4, kind: input, shape index: {}]   ;;  %s6347_s5 = inlined_call_operand.vmem [shape: f32[2,128,32], index: 5, kind: input, shape index: {}]   ;;  %s6348_s6 = inlined_call_operand.vmem [shape: f32[3,32,64], index: 6, kind: input, shape index: {}]   ;;  %s6349_s7 = inlined_call_operand.vmem [shape: f32[64,3], index: 7, kind: input, shape index: {}]   ;;  %s6350_s8 = inlined_call_operand.vmem [shape: f32[32,128], index: 8, kind: input, shape index: {}]   ;;  %s6351_s9 = inlined_call_operand.hbm [shape: f32[3,2,64], index: 9, kind: output, shape index: {0}]   ;;  %s6352_s10 = inlined_call_operand.hbm [shape: f32[2,3], index: 10, kind: output, shape index: {1}]  }
   0x1   :  { %v62_v0 = vld [vmem:[%s6342_s0] sm:$0xff]  ;;  %v63_v1 = vld [vmem:[%s6342_s0 + $0x8] sm:$0xff] }
   0x2   :  { %17 = vsyncpa [#allocation5], 0  ;;  %v67_v2 = vsel %vm66_vm0, %v62_v0, 0.0  ;;  %v70_v3 = vsel %vm66_vm0, %v63_v1, 0.0  ;;  %v106_v14 = vld [vmem:[%s6344_s2] sm:$0xff]  ;;  %v107_v15 = vld [vmem:[%s6344_s2 + $0x8] sm:$0xff]  ;;  %v43_v46 = vlaneseq }
   0x3   :  { %68 = vadd.xlane.f32.xlu0 %v67_v2  ;;  %v108_v16 = vld [vmem:[%s6344_s2 + $0x10] sm:$0xff]  ;;  %v5237_v17 = vpack.c.bf16 %v107_v15, %v106_v14  ;;  %v109_v18 = vld [vmem:[%s6344_s2 + $0x18] sm:$0xff]  ;;  %v4575_v27 = vld [vmem:[%s6350_s8] ss:$0 sm:$0xff]  ;;  %v5534_v36 = vmov 0.0   ;;  %vm5535_vm1 = vmmov 0  }
   0x4   :  { %v5241_v19 = vpack.c.bf16 %v109_v18, %v108_v16  ;;  %v4576_v29 = vld [vmem:[%s6350_s8 + $0x1] ss:$0 sm:$0xff]  ;;  %4887 = vmatprep.subr.mxu1 %v5534_v36  ;;  %4889 = vmatprep.mubr.msk.f32.mxu1 %vm5535_vm1, %v5534_v36  ;;  %v4577_v37 = vld [vmem:[%s6350_s8 + $0x2] ss:$0 sm:$0xff]  ;;  %s5536_s30 = smov 96   ;;  %vm213_vm2 = vcmask 64512  }
   0x5   :  { %5238 = vmatprep.subr.bf16.mxu0 %v5237_v17  ;;  %v5537_v44 = vmov 1966171168   ;;  %v36_v47 = vld [vmem:[%s6343_s1] sm:$0x3]  ;;  %v44_v50 = vshrl.u32 %v43_v46, 7  ;;  %s5538_s1 = smov 88  }
   0x6   :  { %5240 = vmatpush3.bf16.msra.mxu0 %v5237_v17  ;;  %v41_v45 = vunpack.c.l.s4 %v5537_v44  ;;  %v37_v48 = vsub.f32 1.0, %v36_v47  ;;  %s5539_s13 = smov 120   ;;  %s5540_s14 = smov 80   ;;  %vm4230_vm3 = vcmask 1041409   ;;  %vm4452_vm4 = vcmask 517120  }
   0x7   :  { %71 = vadd.xlane.f32.xlu0 %v70_v3  ;;  %5242 = vmatprep.subr.bf16.mxu0 %v5241_v19  ;;  %v5680_v56 = vsub.s32 0, %v44_v50  ;;  %s5541_s15 = smov 64   ;;  %s5542_s16 = smov 56   ;;  %vm4469_vm5 = vcmask 523264  }
   0x8   :  { %v42_v49 = vunpack.c.0.s8 %v41_v45  ;;  %v38_v51 = vmul.f32 -10000.0, %v37_v48  ;;  %s5543_s0 = smov 112   ;;  %s5544_s17 = smov 48  }
   0x9   :  { %s5545_s18 = smov 72   ;;  %s5546_s19 = smov 104  }
   0xa   :  { %5244 = vmatpush3.bf16.msra.mxu0 %v5241_v19  ;;  %v5676_v52 = vsub.s32 %v42_v49, %v44_v50  ;;  %s5547_s26 = smov 40  }
   0xb   :  { %4882 = vmatprep.subr.mxu0 %v5534_v36 }
   0xc   :  { %v46_v53 = vrot.slane %v38_v51, %v5676_v52 }
   0xe   :  { %v47_v54 = vcombine.high %v46_v53, %v46_v53 }
  0x10   :  { %v61_v55 = vrot.slane %v47_v54, %v5676_v52 }
  0x12   :  { %v5683_v57 = vrot.slane %v61_v55, %v5680_v56 }
  0x90   :  { %v69_v4 = vpop.xlane.xlu0 %68 }
  0x91   :  { %v74_v5 = vmul.f32 0.03125, %v69_v4 }
  0x93   :  { %v76_v6 = vsub.f32 %v62_v0, %v74_v5  ;;  %v54_v0 = vrot.slane %v46_v53, %v5676_v52 }
  0x94   :  { %v72_v7 = vpop.xlane.xlu0 %71 }
  0x95   :  { %v75_v8 = vmul.f32 0.03125, %v72_v7  ;;  %v78_v9 = vmul.f32 %v76_v6, %v76_v6 }
  0x97   :  { %v77_v10 = vsub.f32 %v63_v1, %v75_v8  ;;  %v80_v11 = vsel %vm66_vm0, %v78_v9, 0.0  ;;  %v5693_v1 = vrot.slane %v54_v0, %v5680_v56 }
  0x98   :  { %81 = vadd.xlane.f32.xlu1 %v80_v11 }
  0x99   :  { %v79_v12 = vmul.f32 %v77_v10, %v77_v10 }
  0x9b   :  { %v83_v13 = vsel %vm66_vm0, %v79_v12, 0.0 }
  0x9c   :  { %84 = vadd.xlane.f32.xlu1 %v83_v13 }
 0x125   :  { %v82_v20 = vpop.xlane.xlu1 %81 }
 0x126   :  { %v86_v21 = vmul.f32 0.03125, %v82_v20 }
 0x128   :  { %v88_v22 = vadd.f32 1e-12, %v86_v21 }
 0x129   :  { %v85_v23 = vpop.xlane.xlu1 %84 }
 0x12a   :  { %5394 = vrsqrt.f32 %v88_v22  ;;  %v87_v24 = vmul.f32 0.03125, %v85_v23 }
 0x12c   :  { %v89_v25 = vadd.f32 1e-12, %v87_v24 }
 0x12e   :  { %5396 = vrsqrt.f32 %v89_v25 }
 0x134   :  { %v5395_v26 = vpop.eup %5394 }
 0x135   :  { %v92_v28 = vmul.f32 %v5395_v26, %v76_v6 }
 0x137   :  { %v98_v30 = vmul.f32 %v4575_v27, %v92_v28 }
 0x138   :  { %v5397_v31 = vpop.eup %5396 }
 0x139   :  { %v93_v32 = vmul.f32 %v5397_v31, %v77_v10  ;;  %v5636_v33 = vadd.f32 %v4576_v29, %v98_v30 }
 0x13b   :  { %v99_v34 = vmul.f32 %v4575_v27, %v93_v32  ;;  %4879 = vmatprep.mubr.msk.f32.mxu0 %vm66_vm0, %v5636_v33 }
 0x13d   :  { %v5640_v35 = vadd.f32 %v4576_v29, %v99_v34 }
 0x13f   :  { %4880 = vmatmul.mubr.msk.f32.vlgmr.msra.gmra.mrb[0].mxu0 %vm66_vm0, %v5640_v35 }
 0x140   :  { %4884 = vmatprep.mubr.msk.f32.mxu0 %vm5535_vm1, %v5534_v36 }
 0x212   :  { %v4881_v38 = vpop.f32.mrb[0].mxu0 }
 0x213   :  { %v5653_v39 = vadd.f32 %v4881_v38, %v4577_v37  ;;  %v187_v40 = vpop.f32.mrb[1].mxu0 }
 0x214   :  { %v5655_v41 = vadd.f32 %v4577_v37, %v187_v40 }
 0x215   :  { %289 = vrot.lane.b32.xlu0 %v5653_v39, %s5536_s30 }
 0x216   :  { %211 = vrot.lane.b32.xlu1 %v5655_v41, %s5536_s30 }
 0x287   :  { %v290_v42 = vpop.permute.xlu0 %289 }
 0x288   :  { %4888 = vmatpush3.xpose.msk.msra.mxu1 %vm213_vm2, %v290_v42  ;;  %v212_v43 = vpop.permute.xlu1 %211 }
 0x289   :  { %4883 = vmatpush3.xpose.msk.msra.mxu0 %vm213_vm2, %v212_v43  ;;  %4897 = vmatprep.subr.mxu1 %v5534_v36 }
 0x28a   :  { %4892 = vmatprep.subr.mxu0 %v5534_v36 }
 0x28b   :  { %4890 = vmatmul.mubr.msk.f32.vlgmr.msra.gmra.mrb[0].mxu1 %vm213_vm2, %v5653_v39 }
 0x28c   :  { %4885 = vmatmul.mubr.msk.f32.vlgmr.msra.gmra.mrb[2].mxu0 %vm213_vm2, %v5655_v41  ;;  %4899 = vmatprep.mubr.msk.f32.mxu1 %vm5535_vm1, %v5534_v36 }
 0x28d   :  { %4894 = vmatprep.mubr.msk.f32.mxu0 %vm5535_vm1, %v5534_v36 }
 0x35e   :  { %v361_v58 = vpop.f32.mrb[0].mxu1 }
 0x35f   :  { %v362_v59 = vadd.f32 %v361_v58, %v5683_v57  ;;  %v284_v60 = vpop.f32.mrb[2].mxu0  ;;  %v4891_v61 = vpop.f32.mrb[1].mxu1 }
 0x360   :  { %v4886_v62 = vpop.f32.mrb[3].mxu0  ;;  %v285_v2 = vadd.f32 %v284_v60, %v5693_v1 }
 0x361   :  { %v368_v63 = vsel %vm213_vm2, %v362_v59, -inf }
 0x362   :  { %369 = vmax.xlane.f32.xlu1 %v368_v63  ;;  %v365_v3 = vsel %vm213_vm2, %v285_v2, -inf }
 0x373   :  { %619 = vrot.lane.b32.xlu1 %v5653_v39, %s5538_s1 }
 0x377   :  { %617 = vrot.lane.b32.xlu1 %v5653_v39, %s5539_s13 }
 0x39b   :  { %366 = vmax.xlane.f32.xlu1 %v365_v3 }
 0x3ac   :  { %541 = vrot.lane.b32.xlu1 %v5655_v41, %s5538_s1 }
 0x3b0   :  { %539 = vrot.lane.b32.xlu1 %v5655_v41, %s5539_s13 }
 0x3b4   :  { %1033 = vrot.lane.b32.xlu1 %v5655_v41, %s5540_s14 }
 0x3ef   :  { %v370_v4 = vpop.xlane.xlu1 %369 }
 0x3f0   :  { %v372_v5 = vsub.f32 %v362_v59, %v370_v4 }
 0x3f2   :  { %v375_v6 = vmul.f32 1.442695, %v372_v5 }
 0x3f3   :  { %v620_v9 = vpop.permute.xlu1 %619 }
 0x3f4   :  { %5398 = vpow2.f32 %v375_v6 }
 0x3f7   :  { %v618_v10 = vpop.permute.xlu1 %617 }
 0x3fe   :  { %v5399_v7 = vpop.eup %5398 }
 0x3ff   :  { %v380_v8 = vsel %vm213_vm2, %v5399_v7, 0.0 }
 0x400   :  { %381 = vadd.xlane.f32.xlu0 %v380_v8 }
 0x416   :  { %463 = vrot.lane.b32.xlu0 %v5653_v39, %s5541_s15 }
 0x428   :  { %v367_v11 = vpop.xlane.xlu1 %366 }
 0x429   :  { %v371_v12 = vsub.f32 %v285_v2, %v367_v11 }
 0x42b   :  { %v373_v13 = vmul.f32 1.442695, %v371_v12 }
 0x42c   :  { %v542_v23 = vpop.permute.xlu1 %541 }
 0x42d   :  { %5400 = vpow2.f32 %v373_v13 }
 0x430   :  { %v540_v25 = vpop.permute.xlu1 %539 }
 0x434   :  { %v1034_v49 = vpop.permute.xlu1 %1033 }
 0x437   :  { %v5401_v14 = vpop.eup %5400 }
 0x438   :  { %v377_v15 = vsel %vm213_vm2, %v5401_v14, 0.0 }
 0x439   :  { %378 = vadd.xlane.f32.xlu0 %v377_v15 }
 0x44f   :  { %387 = vrot.lane.b32.xlu0 %v5655_v41, %s5541_s15 }
 0x48d   :  { %v382_v16 = vpop.xlane.xlu0 %381 }
 0x48e   :  { %5402 = vrcp.f32 %v382_v16  ;;  %v197_v16 = vld [vmem:[%s6345_s3 + $0x8] sm:$0xff] }
 0x491   :  { %v464_v17 = vpop.permute.xlu0 %463 }
 0x492   :  { %4898 = vmatpush3.msra.mxu1 %v464_v17  ;;  %v196_v17 = vld [vmem:[%s6345_s3] sm:$0xff] }
 0x493   :  { %4907 = vmatprep.subr.mxu1 %v5534_v36 }
 0x498   :  { %v5403_v18 = vpop.eup %5402 }
 0x499   :  { %v386_v19 = vmul.f32 %v5403_v18, %v5399_v7 }
 0x49b   :  { %4900 = vmatmul.mubr.msk.f32.vlgmr.msra.gmra.mrb[2].mxu1 %vm213_vm2, %v386_v19 }
 0x49c   :  { %4908 = vmatpush3.xpose.msk.msra.mxu1 %vm213_vm2, %v620_v9  ;;  %4909 = vmatprep.mubr.msk.f32.mxu1 %vm5535_vm1, %v5534_v36 }
 0x49d   :  { %4917 = vmatprep.subr.mxu1 %v5534_v36 }
 0x49f   :  { %4910 = vmatmul.mubr.msk.f32.vlgmr.msra.gmra.mrb[4].mxu1 %vm213_vm2, %v618_v10 }
 0x4a0   :  { %4919 = vmatprep.mubr.msk.f32.mxu1 %vm5535_vm1, %v5534_v36 }
 0x4c6   :  { %v379_v20 = vpop.xlane.xlu0 %378 }
 0x4c7   :  { %5404 = vrcp.f32 %v379_v20 }
 0x4ca   :  { %v388_v21 = vpop.permute.xlu0 %387 }
 0x4cb   :  { %4893 = vmatpush3.msra.mxu0 %v388_v21 }
 0x4cc   :  { %4902 = vmatprep.subr.mxu0 %v5534_v36 }
 0x4d1   :  { %v5405_v22 = vpop.eup %5404 }
 0x4d2   :  { %v385_v24 = vmul.f32 %v5405_v22, %v5401_v14 }
 0x4d4   :  { %4895 = vmatmul.mubr.msk.f32.vlgmr.msra.gmra.mrb[4].mxu0 %vm213_vm2, %v385_v24 }
 0x4d5   :  { %4903 = vmatpush3.xpose.msk.msra.mxu0 %vm213_vm2, %v542_v23  ;;  %4904 = vmatprep.mubr.msk.f32.mxu0 %vm5535_vm1, %v5534_v36 }
 0x4d6   :  { %4912 = vmatprep.subr.mxu0 %v5534_v36 }
 0x4d8   :  { %4905 = vmatmul.mubr.msk.f32.vlgmr.msra.gmra.mrb[6].mxu0 %vm213_vm2, %v540_v25 }
 0x4d9   :  { %4914 = vmatprep.mubr.msk.f32.mxu0 %vm5535_vm1, %v5534_v36 }
 0x56e   :  { %v5727_v26 = vpop.f32.mrb[2].mxu1 }
 0x56f   :  { %v4901_v27 = vpop.f32.mrb[3].mxu1 }
 0x572   :  { %v691_v28 = vpop.f32.mrb[4].mxu1 }
 0x573   :  { %v692_v29 = vadd.f32 %v691_v28, %v5683_v57  ;;  %v4911_v30 = vpop.f32.mrb[5].mxu1 }
 0x575   :  { %v698_v31 = vsel %vm213_vm2, %v692_v29, -inf }
 0x576   :  { %699 = vmax.xlane.f32.xlu0 %v698_v31 }
 0x58c   :  { %793 = vrot.lane.b32.xlu0 %v5653_v39, %s5542_s16 }
 0x590   :  { %1031 = vrot.lane.b32.xlu0 %v5655_v41, %s5543_s0 }
 0x594   :  { %1109 = vrot.lane.b32.xlu0 %v5653_v39, %s5543_s0 }
 0x5a7   :  { %v5737_v32 = vpop.f32.mrb[4].mxu0 }
 0x5a8   :  { %v4896_v34 = vpop.f32.mrb[5].mxu0 }
 0x5ab   :  { %v613_v37 = vpop.f32.mrb[6].mxu0 }
 0x5ac   :  { %v4906_v38 = vpop.f32.mrb[7].mxu0  ;;  %v614_v47 = vadd.f32 %v613_v37, %v5693_v1  ;;  %v198_v37 = vld [vmem:[%s6345_s3 + $0x10] sm:$0xff] }
 0x5ae   :  { %v695_v48 = vsel %vm213_vm2, %v614_v47, -inf }
 0x603   :  { %v700_v40 = vpop.xlane.xlu0 %699 }
 0x604   :  { %v702_v42 = vsub.f32 %v692_v29, %v700_v40 }
 0x606   :  { %v705_v43 = vmul.f32 1.442695, %v702_v42 }
 0x607   :  { %v794_v44 = vpop.permute.xlu0 %793 }
 0x608   :  { %5406 = vpow2.f32 %v705_v43  ;;  %4918 = vmatpush3.msra.mxu1 %v794_v44 }
 0x609   :  { %4932 = vmatprep.subr.mxu1 %v5534_v36 }
 0x60b   :  { %v1032_v54 = vpop.permute.xlu0 %1031 }
 0x60f   :  { %v1110_v58 = vpop.permute.xlu0 %1109 }
 0x612   :  { %v5407_v45 = vpop.eup %5406 }
 0x613   :  { %v710_v46 = vsel %vm213_vm2, %v5407_v45, 0.0 }
 0x614   :  { %711 = vadd.xlane.f32.xlu1 %v710_v46 }
 0x625   :  { %1111 = vrot.lane.b32.xlu1 %v5653_v39, %s5540_s14 }
 0x649   :  { %696 = vmax.xlane.f32.xlu1 %v695_v48 }
 0x6a1   :  { %v712_v50 = vpop.xlane.xlu1 %711 }
 0x6a2   :  { %5408 = vrcp.f32 %v712_v50 }
 0x6a5   :  { %v1112_v55 = vpop.permute.xlu1 %1111 }
 0x6ac   :  { %v5409_v51 = vpop.eup %5408 }
 0x6ad   :  { %v716_v53 = vmul.f32 %v5409_v51, %v5407_v45 }
 0x6af   :  { %4920 = vmatmul.mubr.msk.f32.vlgmr.msra.gmra.mrb[6].mxu1 %vm213_vm2, %v716_v53 }
 0x6b0   :  { %4933 = vmatpush3.xpose.msk.msra.mxu1 %vm213_vm2, %v1034_v49  ;;  %4934 = vmatprep.mubr.msk.f32.mxu1 %vm5535_vm1, %v5534_v36 }
 0x6b1   :  { %4937 = vmatprep.subr.mxu1 %v5534_v36 }
 0x6b3   :  { %4935 = vmatmul.mubr.msk.f32.vlgmr.msra.gmra.mrb[8].mxu1 %vm213_vm2, %v1032_v54 }
 0x6b4   :  { %4938 = vmatpush3.xpose.msk.msra.mxu1 %vm213_vm2, %v1112_v55  ;;  %4939 = vmatprep.mubr.msk.f32.mxu1 %vm5535_vm1, %v5534_v36 }
 0x6b5   :  { %4947 = vmatprep.subr.mxu1 %v5534_v36 }
 0x6b7   :  { %4940 = vmatmul.mubr.msk.f32.vlgmr.msra.gmra.mrb[10].mxu1 %vm213_vm2, %v1110_v58 }
 0x6b8   :  { %4949 = vmatprep.mubr.msk.f32.mxu1 %vm5535_vm1, %v5534_v36 }
 0x6d6   :  { %v697_v59 = vpop.xlane.xlu1 %696 }
 0x6d7   :  { %v701_v60 = vsub.f32 %v614_v47, %v697_v59 }
 0x6d9   :  { %v703_v61 = vmul.f32 1.442695, %v701_v60 }
 0x6db   :  { %5410 = vpow2.f32 %v703_v61 }
 0x6e5   :  { %v5411_v62 = vpop.eup %5410 }
 0x6e6   :  { %v707_v63 = vsel %vm213_vm2, %v5411_v62, 0.0 }
 0x6e7   :  { %708 = vadd.xlane.f32.xlu0 %v707_v63 }
 0x6fd   :  { %717 = vrot.lane.b32.xlu0 %v5655_v41, %s5542_s16 }
 0x701   :  { %1285 = vrot.lane.b32.xlu0 %v5653_v39, %s5544_s17 }
 0x705   :  { %1446 = vrot.lane.b32.xlu0 %v5655_v41, %s5545_s18 }
 0x709   :  { %1524 = vrot.lane.b32.xlu0 %v5653_v39, %s5545_s18 }
 0x70d   :  { %1444 = vrot.lane.b32.xlu0 %v5655_v41, %s5546_s19 }
 0x774   :  { %v709_v0 = vpop.xlane.xlu0 %708 }
 0x775   :  { %5412 = vrcp.f32 %v709_v0 }
 0x778   :  { %v718_v2 = vpop.permute.xlu0 %717 }
 0x779   :  { %4913 = vmatpush3.msra.mxu0 %v718_v2 }
 0x77a   :  { %4922 = vmatprep.subr.mxu0 %v197_v16 }
 0x77c   :  { %v1286_v3 = vpop.permute.xlu0 %1285 }
 0x77d   :  { %4948 = vmatpush3.msra.mxu1 %v1286_v3 }
 0x77e   :  { %4957 = vmatprep.subr.mxu1 %v5534_v36 }
 0x77f   :  { %v5413_v4 = vpop.eup %5412 }
 0x780   :  { %v715_v5 = vmul.f32 %v5413_v4, %v5411_v62  ;;  %v1447_v40 = vpop.permute.xlu0 %1446 }
 0x782   :  { %4915 = vmatmul.mubr.msk.f32.vlgmr.msra.gmra.mrb[8].mxu0 %vm213_vm2, %v715_v5  ;;  %v865_v6 = vpop.f32.mrb[6].mxu1 }
 0x783   :  { %v4921_v7 = vpop.f32.mrb[7].mxu1  ;;  %4923 = vmatpush3.msra.mxu0 %v197_v16  ;;  %v199_v16 = vld [vmem:[%s6345_s3 + $0x18] sm:$0xff] }
 0x784   :  { %4927 = vmatprep.subr.mxu0 %v196_v17  ;;  %v1525_v43 = vpop.permute.xlu0 %1524 }
 0x786   :  { %v1105_v8 = vpop.f32.mrb[8].mxu1 }
 0x787   :  { %v1106_v9 = vadd.f32 %v1105_v8, %v5693_v1  ;;  %v4936_v10 = vpop.f32.mrb[9].mxu1 }
 0x788   :  { %v1445_v45 = vpop.permute.xlu0 %1444 }
 0x789   :  { %v1187_v11 = vsel %vm213_vm2, %v1106_v9, -inf }
 0x78a   :  { %1188 = vmax.xlane.f32.xlu1 %v1187_v11  ;;  %v1183_v12 = vpop.f32.mrb[10].mxu1 }
 0x78b   :  { %v1184_v13 = vadd.f32 %v1183_v12, %v5683_v57  ;;  %v4941_v14 = vpop.f32.mrb[11].mxu1 }
 0x78d   :  { %v1190_v15 = vsel %vm213_vm2, %v1184_v13, -inf }
 0x78e   :  { %1191 = vmax.xlane.f32.xlu1 %v1190_v15 }
 0x817   :  { %v1189_v18 = vpop.xlane.xlu1 %1188 }
 0x818   :  { %v1193_v19 = vsub.f32 %v1106_v9, %v1189_v18 }
 0x81a   :  { %v1195_v20 = vmul.f32 1.442695, %v1193_v19 }
 0x81b   :  { %v1192_v21 = vpop.xlane.xlu1 %1191 }
 0x81c   :  { %5414 = vpow2.f32 %v1195_v20  ;;  %v1194_v22 = vsub.f32 %v1184_v13, %v1192_v21  ;;  %v4612_v20 = vld [vmem:[%s6350_s8 + $0x3] ss:$0 sm:$0xff] }
 0x81e   :  { %v1197_v23 = vmul.f32 1.442695, %v1194_v22 }
 0x820   :  { %5416 = vpow2.f32 %v1197_v23 }
 0x826   :  { %v5415_v24 = vpop.eup %5414 }
 0x827   :  { %v1199_v25 = vsel %vm213_vm2, %v5415_v24, 0.0 }
 0x828   :  { %1200 = vadd.xlane.f32.xlu1 %v1199_v25 }
 0x82a   :  { %v5417_v27 = vpop.eup %5416 }
 0x82b   :  { %v1202_v28 = vsel %vm213_vm2, %v5417_v27, 0.0 }
 0x82c   :  { %1203 = vadd.xlane.f32.xlu1 %v1202_v28 }
 0x83d   :  { %1209 = vrot.lane.b32.xlu1 %v5655_v41, %s5544_s17 }
 0x841   :  { %1522 = vrot.lane.b32.xlu1 %v5653_v39, %s5546_s19 }
 0x855   :  { %v789_v29 = vpop.f32.mrb[8].mxu0 }
 0x856   :  { %v4916_v30 = vpop.f32.mrb[9].mxu0  ;;  %4924 = vmatprep.mubr.msk.f32.mxu0 %vm213_vm2, %v789_v29 }
 0x857   :  { %4925 = vmatmul.mubr.msk.f32.vlgmr.msra.gmra.mrb[10].mxu0 %vm213_vm2, %v865_v6 }
 0x858   :  { %4929 = vmatprep.mubr.msk.f32.mxu0 %vm213_vm2, %v5737_v32  ;;  %4928 = vmatpush3.msra.mxu0 %v196_v17 }
 0x859   :  { %4942 = vmatprep.subr.mxu0 %v5534_v36 }
 0x85f   :  { %4930 = vmatmul.mubr.msk.f32.vlgmr.msra.gmra.mrb[10].mxu0 %vm213_vm2, %v5727_v26 }
 0x860   :  { %4944 = vmatprep.mubr.msk.f32.mxu0 %vm5535_vm1, %v5534_v36 }
 0x8b5   :  { %v1201_v31 = vpop.xlane.xlu1 %1200 }
 0x8b6   :  { %5418 = vrcp.f32 %v1201_v31 }
 0x8b9   :  { %v1204_v34 = vpop.xlane.xlu1 %1203 }
 0x8ba   :  { %5420 = vrcp.f32 %v1204_v34 }
 0x8bd   :  { %v1210_v38 = vpop.permute.xlu1 %1209 }
 0x8be   :  { %4943 = vmatpush3.msra.mxu0 %v1210_v38 }
 0x8bf   :  { %4952 = vmatprep.subr.mxu0 %v198_v37 }
 0x8c0   :  { %v5419_v32 = vpop.eup %5418 }
 0x8c1   :  { %v1207_v42 = vmul.f32 %v5419_v32, %v5415_v24  ;;  %v1523_v50 = vpop.permute.xlu1 %1522 }
 0x8c3   :  { %4945 = vmatmul.mubr.msk.f32.vlgmr.msra.gmra.mrb[12].mxu0 %vm213_vm2, %v1207_v42 }
 0x8c4   :  { %v5421_v26 = vpop.eup %5420  ;;  %4953 = vmatpush3.msra.mxu0 %v198_v37 }
 0x8c5   :  { %v1208_v44 = vmul.f32 %v5421_v26, %v5417_v27  ;;  %4962 = vmatprep.subr.mxu0 %v5534_v36 }
 0x8c7   :  { %4950 = vmatmul.mubr.msk.f32.vlgmr.msra.gmra.mrb[12].mxu1 %vm213_vm2, %v1208_v44  ;;  %v1906_v44 = vld [vmem:[%s6346_s4] sm:$0xff] }
 0x8c8   :  { %4958 = vmatpush3.xpose.msk.msra.mxu1 %vm213_vm2, %v1447_v40  ;;  %4959 = vmatprep.mubr.msk.f32.mxu1 %vm5535_vm1, %v5534_v36 }
 0x8c9   :  { %4967 = vmatprep.subr.mxu1 %v5534_v36 }
 0x8cb   :  { %4960 = vmatmul.mubr.msk.f32.vlgmr.msra.gmra.mrb[14].mxu1 %vm213_vm2, %v1445_v45  ;;  %v1907_v45 = vld [vmem:[%s6346_s4 + $0x8] sm:$0xff] }
 0x8cc   :  { %4969 = vmatprep.mubr.msk.f32.mxu1 %vm5535_vm1, %v5534_v36 }
 0x996   :  { %v1281_v46 = vpop.f32.mrb[12].mxu0 }
 0x997   :  { %v4946_v47 = vpop.f32.mrb[13].mxu0  ;;  %4954 = vmatprep.mubr.msk.f32.mxu0 %vm213_vm2, %v1281_v46  ;;  %v5245_v46 = vpack.c.bf16 %v1907_v45, %v1906_v44 }
 0x998   :  { %v1908_v47 = vld [vmem:[%s6346_s4 + $0x10] sm:$0xff] }
 0x99a   :  { %v1357_v48 = vpop.f32.mrb[12].mxu1 }
 0x99b   :  { %v4951_v49 = vpop.f32.mrb[13].mxu1  ;;  %4955 = vmatmul.mubr.msk.f32.vlgmr.msra.gmra.mrb[10].mxu0 %vm213_vm2, %v1357_v48  ;;  %v1909_v48 = vld [vmem:[%s6346_s4 + $0x18] sm:$0xff] }
 0x99c   :  { %4963 = vmatpush3.xpose.msk.msra.mxu0 %vm213_vm2, %v1525_v43  ;;  %4964 = vmatprep.mubr.msk.f32.mxu0 %vm5535_vm1, %v5534_v36  ;;  %v5249_v49 = vpack.c.bf16 %v1909_v48, %v1908_v47  ;;  %v4618_v48 = vld [vmem:[%s6350_s8 + $0x7] ss:$0 sm:$0xff] }
 0x99d   :  { %4972 = vmatprep.subr.mxu0 %v5534_v36 }
 0x99e   :  { %v1518_v51 = vpop.f32.mrb[14].mxu1 }
 0x99f   :  { %v1519_v53 = vadd.f32 %v1518_v51, %v5693_v1  ;;  %v4961_v54 = vpop.f32.mrb[15].mxu1  ;;  %4965 = vmatmul.mubr.msk.f32.vlgmr.msra.gmra.mrb[14].mxu0 %vm213_vm2, %v1523_v50  ;;  %v2006_v50 = vld [vmem:[%s6347_s5] sm:$0xff]  ;;  %v2007_v51 = vld [vmem:[%s6347_s5 + $0x8] sm:$0xff] }
 0x9a0   :  { %4974 = vmatprep.mubr.msk.f32.mxu0 %vm5535_vm1, %v5534_v36  ;;  %v5253_v54 = vpack.c.bf16 %v2007_v51, %v2006_v50 }
 0x9a1   :  { %v1600_v55 = vsel %vm213_vm2, %v1519_v53, -inf }
 0x9a2   :  { %1601 = vmax.xlane.f32.xlu0 %v1600_v55  ;;  %v2009_v55 = vld [vmem:[%s6347_s5 + $0x18] sm:$0xff] }
 0xa2f   :  { %v1602_v58 = vpop.xlane.xlu0 %1601 }
 0xa30   :  { %v1606_v59 = vsub.f32 %v1519_v53, %v1602_v58  ;;  %v2008_v53 = vld [vmem:[%s6347_s5 + $0x10] sm:$0xff] }
 0xa31   :  { %v5257_v58 = vpack.c.bf16 %v2009_v55, %v2008_v53 }
 0xa32   :  { %v1608_v60 = vmul.f32 1.442695, %v1606_v59  ;;  %v2010_v59 = vld [vmem:[%s6347_s5 + $0x20] sm:$0xff] }
 0xa34   :  { %5422 = vpow2.f32 %v1608_v60  ;;  %v2011_v60 = vld [vmem:[%s6347_s5 + $0x28] sm:$0xff] }
 0xa3e   :  { %v5423_v61 = vpop.eup %5422 }
 0xa3f   :  { %v1612_v62 = vsel %vm213_vm2, %v5423_v61, 0.0 }
 0xa40   :  { %1613 = vadd.xlane.f32.xlu0 %v1612_v62 }
 0xa72   :  { %v1596_v63 = vpop.f32.mrb[14].mxu0 }
 0xa73   :  { %v1597_v0 = vadd.f32 %v1596_v63, %v5683_v57  ;;  %v4966_v2 = vpop.f32.mrb[15].mxu0 }
 0xa75   :  { %v1603_v3 = vsel %vm213_vm2, %v1597_v0, -inf }
 0xa76   :  { %1604 = vmax.xlane.f32.xlu1 %v1603_v3 }
 0xa87   :  { %1698 = vrot.lane.b32.xlu1 %v5653_v39, %s5547_s26 }
 0xacd   :  { %v1614_v10 = vpop.xlane.xlu0 %1613 }
 0xb03   :  { %v1605_v4 = vpop.xlane.xlu1 %1604 }
 0xb04   :  { %v1607_v5 = vsub.f32 %v1597_v0, %v1605_v4 }
 0xb06   :  { %v1610_v6 = vmul.f32 1.442695, %v1607_v5 }
 0xb07   :  { %v1699_v7 = vpop.permute.xlu1 %1698 }
 0xb08   :  { %5424 = vpow2.f32 %v1610_v6  ;;  %4973 = vmatpush3.msra.mxu0 %v1699_v7  ;;  %v4613_v6 = vld [vmem:[%s6350_s8 + $0x4] ss:$0 sm:$0xff] }
 0xb09   :  { %5426 = vrcp.f32 %v1614_v10  ;;  %4977 = vmatprep.subr.mxu0 %v199_v16  ;;  %v4614_v10 = vld [vmem:[%s6350_s8 + $0x5] ss:$0 sm:$0xff] }
 0xb12   :  { %v5425_v8 = vpop.eup %5424 }
 0xb13   :  { %v1615_v9 = vsel %vm213_vm2, %v5425_v8, 0.0  ;;  %v5427_v12 = vpop.eup %5426 }
 0xb14   :  { %1616 = vadd.xlane.f32.xlu0 %v1615_v9  ;;  %v1620_v13 = vmul.f32 %v5427_v12, %v5423_v61  ;;  %v5261_v61 = vpack.c.bf16 %v2011_v60, %v2010_v59 }
 0xb2a   :  { %1622 = vrot.lane.b32.xlu0 %v5655_v41, %s5547_s26 }
 0xba1   :  { %v1617_v11 = vpop.xlane.xlu0 %1616 }
 0xba2   :  { %5428 = vrcp.f32 %v1617_v11 }
 0xba5   :  { %v1623_v39 = vpop.permute.xlu0 %1622 }
 0xba6   :  { %4968 = vmatpush3.msra.mxu1 %v1623_v39 }
 0xba7   :  { %4970 = vmatmul.mubr.msk.f32.vlgmr.msra.gmra.mrb[16].mxu1 %vm213_vm2, %v1620_v13  ;;  %5246 = vmatprep.subr.bf16.mxu1 %v5245_v46 }
 0xba8   :  { %5248 = vmatpush3.bf16.msra.mxu1 %v5245_v46 }
 0xba9   :  { %5250 = vmatprep.subr.bf16.mxu1 %v5249_v49 }
 0xbac   :  { %v5429_v14 = vpop.eup %5428  ;;  %5252 = vmatpush3.bf16.msra.mxu1 %v5249_v49 }
 0xbad   :  { %v1621_v15 = vmul.f32 %v5429_v14, %v5425_v8  ;;  %v2012_v14 = vld [vmem:[%s6347_s5 + $0x30] sm:$0xff] }
 0xbaf   :  { %4975 = vmatmul.mubr.msk.f32.vlgmr.msra.gmra.mrb[16].mxu0 %vm213_vm2, %v1621_v15  ;;  %v2013_v15 = vld [vmem:[%s6347_s5 + $0x38] sm:$0xff] }
 0xbb0   :  { %4978 = vmatpush3.msra.mxu0 %v199_v16  ;;  %v5265_v16 = vpack.c.bf16 %v2013_v15, %v2012_v14 }
 0xbb1   :  { %5254 = vmatprep.subr.bf16.mxu0 %v5253_v54 }
 0xc7a   :  { %v1694_v41 = vpop.f32.mrb[16].mxu1 }
 0xc7b   :  { %v4971_v17 = vpop.f32.mrb[17].mxu1  ;;  %4979 = vmatprep.mubr.msk.f32.mxu0 %vm213_vm2, %v1694_v41  ;;  %v2014_v41 = vld [vmem:[%s6347_s5 + $0x40] sm:$0xff] }
 0xc7c   :  { %v2015_v17 = vld [vmem:[%s6347_s5 + $0x48] sm:$0xff] }
 0xc82   :  { %v1770_v18 = vpop.f32.mrb[16].mxu0 }
 0xc83   :  { %v4976_v19 = vpop.f32.mrb[17].mxu0  ;;  %4980 = vmatmul.mubr.msk.f32.vlgmr.msra.gmra.mrb[10].mxu0 %vm213_vm2, %v1770_v18  ;;  %v5269_v18 = vpack.c.bf16 %v2015_v17, %v2014_v41 }
 0xc84   :  { %5256 = vmatpush3.bf16.msra.mxu0 %v5253_v54  ;;  %v2016_v19 = vld [vmem:[%s6347_s5 + $0x50] sm:$0xff] }
 0xc85   :  { %5258 = vmatprep.subr.bf16.mxu0 %v5257_v58 }
 0xc88   :  { %5260 = vmatpush3.bf16.msra.mxu0 %v5257_v58 }
 0xc89   :  { %5262 = vmatprep.subr.bf16.mxu0 %v5261_v61 }
 0xc8c   :  { %5264 = vmatpush3.bf16.msra.mxu0 %v5261_v61 }
 0xc8d   :  { %5266 = vmatprep.subr.bf16.mxu0 %v5265_v16 }
 0xc90   :  { %5268 = vmatpush3.bf16.msra.mxu0 %v5265_v16 }
 0xc91   :  { %5270 = vmatprep.subr.bf16.mxu0 %v5269_v18 }
 0xc94   :  { %5272 = vmatpush3.bf16.msra.mxu0 %v5269_v18  ;;  %v4619_v18 = vld [vmem:[%s6350_s8 + $0x8] ss:$0 sm:$0xff] }
 0xd56   :  { %v4981_v21 = vpop.f32.mrb[10].mxu0 }
 0xd57   :  { %v1863_v22 = vadd.f32 %v4981_v21, %v4612_v20  ;;  %v1846_v23 = vpop.f32.mrb[11].mxu0 }
 0xd58   :  { %v1862_v24 = vadd.f32 %v4612_v20, %v1846_v23  ;;  %v2017_v20 = vld [vmem:[%s6347_s5 + $0x58] sm:$0xff]  ;;  %v2019_v23 = vld [vmem:[%s6347_s5 + $0x68] sm:$0xff] }
 0xd59   :  { %v1865_v25 = vadd.f32 %v1863_v22, %v5640_v35  ;;  %v5273_v21 = vpack.c.bf16 %v2017_v20, %v2016_v19  ;;  %v2018_v22 = vld [vmem:[%s6347_s5 + $0x60] sm:$0xff] }
 0xd5a   :  { %v1864_v27 = vadd.f32 %v1862_v24, %v5636_v33  ;;  %v5277_v24 = vpack.c.bf16 %v2019_v23, %v2018_v22  ;;  %v4620_v22 = vld [vmem:[%s6350_s8 + $0x9] ss:$0 sm:$0xff] }
 0xd5b   :  { %v1871_v28 = vsel %vm66_vm0, %v1865_v25, 0.0  ;;  %5274 = vmatprep.subr.bf16.mxu0 %v5273_v21 }
 0xd5c   :  { %1872 = vadd.xlane.f32.xlu0 %v1871_v28  ;;  %v1868_v29 = vsel %vm66_vm0, %v1864_v27, 0.0  ;;  %5276 = vmatpush3.bf16.msra.mxu0 %v5273_v21 }
 0xd5d   :  { %1869 = vadd.xlane.f32.xlu1 %v1868_v29  ;;  %5278 = vmatprep.subr.bf16.mxu0 %v5277_v24  ;;  %v4615_v29 = vld [vmem:[%s6350_s8 + $0x6] ss:$0 sm:$0xff] }
 0xd60   :  { %5280 = vmatpush3.bf16.msra.mxu0 %v5277_v24 }
 0xde9   :  { %v1873_v30 = vpop.xlane.xlu0 %1872 }
 0xdea   :  { %v1875_v31 = vmul.f32 0.03125, %v1873_v30  ;;  %v1870_v34 = vpop.xlane.xlu1 %1869 }
 0xdeb   :  { %v1874_v37 = vmul.f32 0.03125, %v1870_v34 }
 0xdec   :  { %v1877_v38 = vsub.f32 %v1865_v25, %v1875_v31  ;;  %v2020_v25 = vld [vmem:[%s6347_s5 + $0x70] sm:$0xff] }
 0xded   :  { %v1876_v40 = vsub.f32 %v1864_v27, %v1874_v37  ;;  %v2021_v27 = vld [vmem:[%s6347_s5 + $0x78] sm:$0xff] }
 0xdee   :  { %v1879_v32 = vmul.f32 %v1877_v38, %v1877_v38  ;;  %v5281_v28 = vpack.c.bf16 %v2021_v27, %v2020_v25 }
 0xdef   :  { %v1878_v42 = vmul.f32 %v1876_v40, %v1876_v40 }
 0xdf0   :  { %v1883_v26 = vsel %vm66_vm0, %v1879_v32, 0.0  ;;  %5282 = vmatprep.subr.bf16.mxu0 %v5281_v28 }
 0xdf1   :  { %1884 = vadd.xlane.f32.xlu1 %v1883_v26  ;;  %v1880_v43 = vsel %vm66_vm0, %v1878_v42, 0.0  ;;  %5284 = vmatpush3.bf16.msra.mxu0 %v5281_v28  ;;  %v4625_v28 = vld [vmem:[%s6350_s8 + $0xa] ss:$0 sm:$0xff] }
 0xdf2   :  { %1881 = vadd.xlane.f32.xlu0 %v1880_v43  ;;  %5069 = vmatprep.subr.mxu0 %v5534_v36 }
 0xe7e   :  { %v1885_v62 = vpop.xlane.xlu1 %1884 }
 0xe7f   :  { %v1887_v63 = vmul.f32 0.03125, %v1885_v62  ;;  %v1882_v0 = vpop.xlane.xlu0 %1881 }
 0xe80   :  { %v1886_v2 = vmul.f32 0.03125, %v1882_v0 }
 0xe81   :  { %v1889_v3 = vadd.f32 1e-12, %v1887_v63 }
 0xe82   :  { %v1888_v4 = vadd.f32 1e-12, %v1886_v2 }
 0xe83   :  { %5430 = vrsqrt.f32 %v1889_v3 }
 0xe84   :  { %5432 = vrsqrt.f32 %v1888_v4 }
 0xe8d   :  { %v5431_v5 = vpop.eup %5430 }
 0xe8e   :  { %v5433_v7 = vpop.eup %5432  ;;  %v1893_v8 = vmul.f32 %v5431_v5, %v1877_v38 }
 0xe8f   :  { %v1892_v9 = vmul.f32 %v5433_v7, %v1876_v40  ;;  %v4621_v7 = vld [vmem:[%s6344_s2 + $0x20] sm:$0xff] }
 0xe90   :  { %v1899_v11 = vmul.f32 %v4613_v6, %v1893_v8  ;;  %v4622_v8 = vld [vmem:[%s6344_s2 + $0x28] sm:$0xff] }
 0xe91   :  { %v1898_v12 = vmul.f32 %v4613_v6, %v1892_v9  ;;  %v5285_v9 = vpack.c.bf16 %v4622_v8, %v4621_v7 }
 0xe92   :  { %v1905_v39 = vadd.f32 %v4614_v10, %v1899_v11  ;;  %v4624_v11 = vld [vmem:[%s6344_s2 + $0x38] sm:$0xff] }
 0xe93   :  { %v1904_v13 = vadd.f32 %v4614_v10, %v1898_v12  ;;  %v4623_v10 = vld [vmem:[%s6344_s2 + $0x30] sm:$0xff]  ;;  %5286 = vmatprep.subr.bf16.mxu1 %v5285_v9 }
 0xe94   :  { %v5289_v12 = vpack.c.bf16 %v4624_v11, %v4623_v10 }
 0xe95   :  { %4990 = vmatprep.mubr.msk.f32.mxu1 %vm66_vm0, %v1904_v13 }
 0xe96   :  { %4991 = vmatmul.mubr.msk.f32.vlgmr.msra.gmra.mrb[18].mxu1 %vm66_vm0, %v1905_v39 }
 0xe97   :  { %5288 = vmatpush3.bf16.msra.mxu1 %v5285_v9 }
 0xe98   :  { %5290 = vmatprep.subr.bf16.mxu1 %v5289_v12 }
 0xe9b   :  { %5292 = vmatpush3.bf16.msra.mxu1 %v5289_v12 }
 0xe9c   :  { %5039 = vmatprep.subr.mxu1 %v5534_v36 }
 0xf69   :  { %v4992_v30 = vpop.f32.mrb[18].mxu1 }
 0xf6a   :  { %v1993_v31 = vadd.f32 %v4992_v30, %v4615_v29  ;;  %v1987_v34 = vpop.f32.mrb[19].mxu1 }
 0xf6b   :  { %v1988_v37 = vadd.f32 %v4615_v29, %v1987_v34 }
 0xf6c   :  { %v1999_v38 = vmul.f32 0.70710677, %v1993_v31  ;;  %v1997_v45 = vmul.f32 0.5, %v1993_v31 }
 0xf6d   :  { %v1998_v40 = vmul.f32 0.70710677, %v1988_v37  ;;  %v1996_v43 = vmul.f32 0.5, %v1988_v37 }
 0xf6e   :  { %5434 = verf.f32 %v1999_v38 }
 0xf6f   :  { %5436 = verf.f32 %v1998_v40 }
 0xf78   :  { %v5435_v32 = vpop.eup %5434 }
 0xf79   :  { %v5437_v42 = vpop.eup %5436  ;;  %v2003_v26 = vadd.f32 1.0, %v5435_v32 }
 0xf7a   :  { %v2002_v44 = vadd.f32 1.0, %v5437_v42 }
 0xf7b   :  { %v2005_v47 = vmul.f32 %v2003_v26, %v1997_v45 }
 0xf7c   :  { %v2004_v46 = vmul.f32 %v2002_v44, %v1996_v43 }
 0xf7e   :  { %5025 = vmatprep.mubr.f32.mxu0 %v2004_v46 }
 0xf7f   :  { %5026 = vmatmul.mubr.f32.vlgmr.msra.gmra.mrb[18].mxu0 %v2005_v47 }
 0xf80   :  { %5071 = vmatprep.mubr.msk.f32.mxu0 %vm5535_vm1, %v5534_v36 }
0x1052   :  { %v5027_v49 = vpop.f32.mrb[18].mxu0 }
0x1053   :  { %v2099_v50 = vadd.f32 %v5027_v49, %v4618_v48  ;;  %v2093_v51 = vpop.f32.mrb[19].mxu0 }
0x1054   :  { %v2094_v53 = vadd.f32 %v4618_v48, %v2093_v51 }
0x1055   :  { %v2103_v54 = vadd.f32 %v2099_v50, %v1905_v39 }
0x1056   :  { %v2102_v55 = vadd.f32 %v2094_v53, %v1904_v13 }
0x1057   :  { %v2109_v58 = vsel %vm66_vm0, %v2103_v54, 0.0 }
0x1058   :  { %2110 = vadd.xlane.f32.xlu1 %v2109_v58  ;;  %v2106_v59 = vsel %vm66_vm0, %v2102_v55, 0.0 }
0x1059   :  { %2107 = vadd.xlane.f32.xlu0 %v2106_v59 }
0x10e5   :  { %v2111_v60 = vpop.xlane.xlu1 %2110 }
0x10e6   :  { %v2113_v61 = vmul.f32 0.03125, %v2111_v60  ;;  %v2108_v62 = vpop.xlane.xlu0 %2107 }
0x10e7   :  { %v2112_v63 = vmul.f32 0.03125, %v2108_v62 }
0x10e8   :  { %v2115_v0 = vsub.f32 %v2103_v54, %v2113_v61 }
0x10e9   :  { %v2114_v2 = vsub.f32 %v2102_v55, %v2112_v63 }
0x10ea   :  { %v2117_v3 = vmul.f32 %v2115_v0, %v2115_v0 }
0x10eb   :  { %v2116_v4 = vmul.f32 %v2114_v2, %v2114_v2 }
0x10ec   :  { %v2121_v5 = vsel %vm66_vm0, %v2117_v3, 0.0 }
0x10ed   :  { %2122 = vadd.xlane.f32.xlu1 %v2121_v5  ;;  %v2118_v6 = vsel %vm66_vm0, %v2116_v4, 0.0 }
0x10ee   :  { %2119 = vadd.xlane.f32.xlu0 %v2118_v6 }
0x117a   :  { %v2123_v13 = vpop.xlane.xlu1 %2122 }
0x117b   :  { %v2125_v39 = vmul.f32 0.03125, %v2123_v13  ;;  %v2120_v14 = vpop.xlane.xlu0 %2119 }
0x117c   :  { %v2124_v15 = vmul.f32 0.03125, %v2120_v14 }
0x117d   :  { %v2127_v16 = vadd.f32 1e-12, %v2125_v39 }
0x117e   :  { %v2126_v41 = vadd.f32 1e-12, %v2124_v15 }
0x117f   :  { %5438 = vrsqrt.f32 %v2127_v16 }
0x1180   :  { %5440 = vrsqrt.f32 %v2126_v41 }
0x1189   :  { %v5439_v17 = vpop.eup %5438 }
0x118a   :  { %v5441_v19 = vpop.eup %5440  ;;  %v2131_v20 = vmul.f32 %v5439_v17, %v2115_v0 }
0x118b   :  { %v2130_v21 = vmul.f32 %v5441_v19, %v2114_v2 }
0x118c   :  { %v2137_v23 = vmul.f32 %v4619_v18, %v2131_v20 }
0x118d   :  { %v2136_v24 = vmul.f32 %v4619_v18, %v2130_v21 }
0x118e   :  { %v5946_v27 = vadd.f32 %v4620_v22, %v2137_v23 }
0x118f   :  { %v5944_v25 = vadd.f32 %v4620_v22, %v2136_v24 }
0x1191   :  { %5036 = vmatprep.mubr.msk.f32.mxu1 %vm66_vm0, %v5944_v25 }
0x1192   :  { %5037 = vmatmul.mubr.msk.f32.vlgmr.msra.gmra.mrb[20].mxu1 %vm66_vm0, %v5946_v27 }
0x1193   :  { %5041 = vmatprep.mubr.msk.f32.mxu1 %vm5535_vm1, %v5534_v36 }
0x1265   :  { %v5038_v29 = vpop.f32.mrb[20].mxu1 }
0x1266   :  { %v5957_v30 = vadd.f32 %v5038_v29, %v4625_v28  ;;  %v2226_v31 = vpop.f32.mrb[21].mxu1 }
0x1267   :  { %v5959_v34 = vadd.f32 %v4625_v28, %v2226_v31 }
0x1268   :  { %2318 = vrot.lane.b32.xlu1 %v5957_v30, %s5536_s30 }
0x1269   :  { %2241 = vrot.lane.b32.xlu0 %v5959_v34, %s5536_s30 }
0x12da   :  { %v2319_v38 = vpop.permute.xlu1 %2318 }
0x12db   :  { %v2242_v37 = vpop.permute.xlu0 %2241 }
0x12dc   :  { %5040 = vmatpush3.xpose.msk.msra.mxu1 %vm213_vm2, %v2242_v37 }
0x12dd   :  { %5044 = vmatprep.subr.mxu1 %v5534_v36 }
0x12df   :  { %5042 = vmatmul.mubr.msk.f32.vlgmr.msra.gmra.mrb[22].mxu1 %vm213_vm2, %v5959_v34 }
0x12e0   :  { %5045 = vmatpush3.xpose.msk.msra.mxu1 %vm213_vm2, %v2319_v38  ;;  %5046 = vmatprep.mubr.msk.f32.mxu1 %vm5535_vm1, %v5534_v36 }
0x12e1   :  { %5049 = vmatprep.subr.mxu1 %v5534_v36 }
0x12e3   :  { %5047 = vmatmul.mubr.msk.f32.vlgmr.msra.gmra.mrb[24].mxu1 %vm213_vm2, %v5957_v30 }
0x12e4   :  { %5051 = vmatprep.mubr.msk.f32.mxu1 %vm5535_vm1, %v5534_v36 }
0x13b2   :  { %v2313_v40 = vpop.f32.mrb[22].mxu1 }
0x13b3   :  { %v2314_v32 = vadd.f32 %v2313_v40, %v5693_v1  ;;  %v5043_v42 = vpop.f32.mrb[23].mxu1 }
0x13b5   :  { %v2394_v26 = vsel %vm213_vm2, %v2314_v32, -inf }
0x13b6   :  { %2395 = vmax.xlane.f32.xlu1 %v2394_v26  ;;  %v2390_v43 = vpop.f32.mrb[24].mxu1 }
0x13b7   :  { %v2391_v44 = vadd.f32 %v2390_v43, %v5683_v57  ;;  %v5048_v45 = vpop.f32.mrb[25].mxu1 }
0x13b9   :  { %v2397_v46 = vsel %vm213_vm2, %v2391_v44, -inf }
0x13ba   :  { %2398 = vmax.xlane.f32.xlu0 %v2397_v46 }
0x13c7   :  { %2492 = vrot.lane.b32.xlu1 %v5957_v30, %s5541_s15 }
0x13cb   :  { %2570 = vrot.lane.b32.xlu1 %v5959_v34, %s5538_s1 }
0x13cf   :  { %2568 = vrot.lane.b32.xlu1 %v5959_v34, %s5539_s13 }
0x1443   :  { %v2396_v47 = vpop.xlane.xlu1 %2395 }
0x1444   :  { %v2400_v48 = vsub.f32 %v2314_v32, %v2396_v47 }
0x1446   :  { %v2402_v49 = vmul.f32 1.442695, %v2400_v48 }
0x1447   :  { %v2399_v50 = vpop.xlane.xlu0 %2398  ;;  %v2493_v60 = vpop.permute.xlu1 %2492 }
0x1448   :  { %5442 = vpow2.f32 %v2402_v49  ;;  %v2401_v51 = vsub.f32 %v2391_v44, %v2399_v50 }
0x144a   :  { %v2404_v53 = vmul.f32 1.442695, %v2401_v51 }
0x144b   :  { %v2571_v61 = vpop.permute.xlu1 %2570 }
0x144c   :  { %5444 = vpow2.f32 %v2404_v53 }
0x144f   :  { %v2569_v62 = vpop.permute.xlu1 %2568 }
0x1452   :  { %v5443_v54 = vpop.eup %5442 }
0x1453   :  { %v2406_v55 = vsel %vm213_vm2, %v5443_v54, 0.0 }
0x1454   :  { %2407 = vadd.xlane.f32.xlu0 %v2406_v55 }
0x1456   :  { %v5445_v58 = vpop.eup %5444 }
0x1457   :  { %v2409_v59 = vsel %vm213_vm2, %v5445_v58, 0.0 }
0x1458   :  { %2410 = vadd.xlane.f32.xlu1 %v2409_v59 }
0x1469   :  { %2646 = vrot.lane.b32.xlu1 %v5957_v30, %s5539_s13 }
0x146a   :  { %2416 = vrot.lane.b32.xlu0 %v5959_v34, %s5541_s15 }
0x146d   :  { %3062 = vrot.lane.b32.xlu1 %v5959_v34, %s5540_s14 }
0x146e   :  { %2648 = vrot.lane.b32.xlu0 %v5957_v30, %s5538_s1 }
0x14e1   :  { %v2408_v63 = vpop.xlane.xlu0 %2407 }
0x14e2   :  { %5446 = vrcp.f32 %v2408_v63 }
0x14e5   :  { %v2411_v0 = vpop.xlane.xlu1 %2410  ;;  %v2417_v2 = vpop.permute.xlu0 %2416 }
0x14e6   :  { %5448 = vrcp.f32 %v2411_v0  ;;  %5050 = vmatpush3.msra.mxu1 %v2417_v2  ;;  %v4629_v0 = vld [vmem:[%s6345_s3 + $0x28] sm:$0xff]  ;;  %v4628_v2 = vld [vmem:[%s6345_s3 + $0x20] sm:$0xff] }
0x14e7   :  { %5054 = vmatprep.subr.mxu1 %v5534_v36 }
0x14e9   :  { %v2649_v7 = vpop.permute.xlu0 %2648  ;;  %v2647_v8 = vpop.permute.xlu1 %2646 }
0x14ec   :  { %v5447_v3 = vpop.eup %5446 }
0x14ed   :  { %v2414_v4 = vmul.f32 %v5447_v3, %v5443_v54  ;;  %v3063_v28 = vpop.permute.xlu1 %3062 }
0x14ef   :  { %5052 = vmatmul.mubr.msk.f32.vlgmr.msra.gmra.mrb[26].mxu1 %vm213_vm2, %v2414_v4 }
0x14f0   :  { %v5449_v5 = vpop.eup %5448  ;;  %5055 = vmatpush3.msra.mxu1 %v2493_v60  ;;  %5056 = vmatprep.mubr.msk.f32.mxu1 %vm5535_vm1, %v5534_v36 }
0x14f1   :  { %v2415_v6 = vmul.f32 %v5449_v5, %v5445_v58  ;;  %5059 = vmatprep.subr.mxu1 %v5534_v36 }
0x14f3   :  { %5057 = vmatmul.mubr.msk.f32.vlgmr.msra.gmra.mrb[28].mxu1 %vm213_vm2, %v2415_v6 }
0x14f4   :  { %5061 = vmatprep.mubr.msk.f32.mxu1 %vm5535_vm1, %v5534_v36 }
0x14f7   :  { %5060 = vmatpush3.xpose.msk.msra.mxu1 %vm213_vm2, %v2571_v61 }
0x14f8   :  { %5064 = vmatprep.subr.mxu1 %v5534_v36 }
0x14fa   :  { %5062 = vmatmul.mubr.msk.f32.vlgmr.msra.gmra.mrb[30].mxu1 %vm213_vm2, %v2569_v62 }
0x14fb   :  { %5065 = vmatpush3.xpose.msk.msra.mxu1 %vm213_vm2, %v2649_v7  ;;  %5066 = vmatprep.mubr.msk.f32.mxu1 %vm5535_vm1, %v5534_v36 }
0x14fc   :  { %5074 = vmatprep.subr.mxu1 %v5534_v36 }
0x14fe   :  { %5067 = vmatmul.mubr.msk.f32.vlgmr.msra.gmra.mrb[32].mxu1 %vm213_vm2, %v2647_v8 }
0x14ff   :  { %5076 = vmatprep.mubr.msk.f32.mxu1 %vm5535_vm1, %v5534_v36 }
0x15c2   :  { %v6015_v9 = vpop.f32.mrb[26].mxu1 }
0x15c3   :  { %v5053_v10 = vpop.f32.mrb[27].mxu1 }
0x15c6   :  { %v6017_v11 = vpop.f32.mrb[28].mxu1 }
0x15c7   :  { %v5058_v12 = vpop.f32.mrb[29].mxu1 }
0x15cd   :  { %v2642_v13 = vpop.f32.mrb[30].mxu1 }
0x15ce   :  { %v5063_v39 = vpop.f32.mrb[31].mxu1  ;;  %v2643_v23 = vadd.f32 %v2642_v13, %v5693_v1 }
0x15d0   :  { %v2724_v24 = vsel %vm213_vm2, %v2643_v23, -inf }
0x15d1   :  { %v2720_v14 = vpop.f32.mrb[32].mxu1 }
0x15d2   :  { %v2721_v15 = vadd.f32 %v2720_v14, %v5683_v57  ;;  %v5068_v16 = vpop.f32.mrb[33].mxu1 }
0x15d4   :  { %v2727_v41 = vsel %vm213_vm2, %v2721_v15, -inf }
0x15d5   :  { %2728 = vmax.xlane.f32.xlu0 %v2727_v41 }
0x15eb   :  { %2822 = vrot.lane.b32.xlu0 %v5957_v30, %s5542_s16 }
0x15ef   :  { %3060 = vrot.lane.b32.xlu0 %v5959_v34, %s5543_s0 }
0x15f3   :  { %3138 = vrot.lane.b32.xlu0 %v5957_v30, %s5543_s0 }
0x1662   :  { %v2729_v17 = vpop.xlane.xlu0 %2728 }
0x1663   :  { %v2731_v18 = vsub.f32 %v2721_v15, %v2729_v17  ;;  %v4630_v17 = vld [vmem:[%s6345_s3 + $0x30] sm:$0xff] }
0x1665   :  { %v2734_v19 = vmul.f32 1.442695, %v2731_v18 }
0x1666   :  { %v2823_v20 = vpop.permute.xlu0 %2822 }
0x1667   :  { %5450 = vpow2.f32 %v2734_v19  ;;  %5075 = vmatpush3.msra.mxu1 %v2823_v20 }
0x1668   :  { %5089 = vmatprep.subr.mxu1 %v5534_v36 }
0x166a   :  { %v3061_v38 = vpop.permute.xlu0 %3060 }
0x166e   :  { %v3139_v32 = vpop.permute.xlu0 %3138 }
0x1671   :  { %v5451_v21 = vpop.eup %5450 }
0x1672   :  { %v2739_v22 = vsel %vm213_vm2, %v5451_v21, 0.0 }
0x1673   :  { %2740 = vadd.xlane.f32.xlu1 %v2739_v22 }
0x1684   :  { %3140 = vrot.lane.b32.xlu1 %v5957_v30, %s5540_s14 }
0x16a8   :  { %2725 = vmax.xlane.f32.xlu1 %v2724_v24 }
0x1700   :  { %v2741_v29 = vpop.xlane.xlu1 %2740 }
0x1701   :  { %5452 = vrcp.f32 %v2741_v29 }
0x1704   :  { %v3141_v40 = vpop.permute.xlu1 %3140 }
0x170b   :  { %v5453_v31 = vpop.eup %5452 }
0x170c   :  { %v2745_v37 = vmul.f32 %v5453_v31, %v5451_v21 }
0x170e   :  { %5077 = vmatmul.mubr.msk.f32.vlgmr.msra.gmra.mrb[34].mxu1 %vm213_vm2, %v2745_v37 }
0x170f   :  { %5090 = vmatpush3.xpose.msk.msra.mxu1 %vm213_vm2, %v3063_v28  ;;  %5091 = vmatprep.mubr.msk.f32.mxu1 %vm5535_vm1, %v5534_v36 }
0x1710   :  { %5094 = vmatprep.subr.mxu1 %v5534_v36 }
0x1712   :  { %5092 = vmatmul.mubr.msk.f32.vlgmr.msra.gmra.mrb[36].mxu1 %vm213_vm2, %v3061_v38 }
0x1713   :  { %5095 = vmatpush3.xpose.msk.msra.mxu1 %vm213_vm2, %v3141_v40  ;;  %5096 = vmatprep.mubr.msk.f32.mxu1 %vm5535_vm1, %v5534_v36 }
0x1714   :  { %5104 = vmatprep.subr.mxu1 %v5534_v36 }
0x1716   :  { %5097 = vmatmul.mubr.msk.f32.vlgmr.msra.gmra.mrb[38].mxu1 %vm213_vm2, %v3139_v32 }
0x1717   :  { %5106 = vmatprep.mubr.msk.f32.mxu1 %vm5535_vm1, %v5534_v36 }
0x1735   :  { %v2726_v42 = vpop.xlane.xlu1 %2725 }
0x1736   :  { %v2730_v26 = vsub.f32 %v2643_v23, %v2726_v42 }
0x1738   :  { %v2732_v43 = vmul.f32 1.442695, %v2730_v26 }
0x173a   :  { %5454 = vpow2.f32 %v2732_v43 }
0x1744   :  { %v5455_v44 = vpop.eup %5454 }
0x1745   :  { %v2736_v45 = vsel %vm213_vm2, %v5455_v44, 0.0 }
0x1746   :  { %2737 = vadd.xlane.f32.xlu0 %v2736_v45 }
0x175c   :  { %2746 = vrot.lane.b32.xlu0 %v5959_v34, %s5542_s16 }
0x1760   :  { %3314 = vrot.lane.b32.xlu0 %v5957_v30, %s5544_s17 }
0x1764   :  { %3475 = vrot.lane.b32.xlu0 %v5959_v34, %s5545_s18 }
0x1768   :  { %3553 = vrot.lane.b32.xlu0 %v5957_v30, %s5545_s18 }
0x176c   :  { %3473 = vrot.lane.b32.xlu0 %v5959_v34, %s5546_s19 }
0x17d3   :  { %v2738_v46 = vpop.xlane.xlu0 %2737 }
0x17d4   :  { %5456 = vrcp.f32 %v2738_v46 }
0x17d7   :  { %v2747_v47 = vpop.permute.xlu0 %2746 }
0x17d8   :  { %5070 = vmatpush3.msra.mxu0 %v2747_v47 }
0x17d9   :  { %5079 = vmatprep.subr.mxu0 %v4629_v0 }
0x17db   :  { %v3315_v48 = vpop.permute.xlu0 %3314 }
0x17dc   :  { %5105 = vmatpush3.msra.mxu1 %v3315_v48 }
0x17dd   :  { %5114 = vmatprep.subr.mxu1 %v5534_v36 }
0x17de   :  { %v5457_v49 = vpop.eup %5456 }
0x17df   :  { %v2744_v50 = vmul.f32 %v5457_v49, %v5455_v44  ;;  %v3476_v19 = vpop.permute.xlu0 %3475 }
0x17e1   :  { %5072 = vmatmul.mubr.msk.f32.vlgmr.msra.gmra.mrb[20].mxu0 %vm213_vm2, %v2744_v50  ;;  %v2894_v51 = vpop.f32.mrb[34].mxu1 }
0x17e2   :  { %v5078_v53 = vpop.f32.mrb[35].mxu1  ;;  %5080 = vmatpush3.msra.mxu0 %v4629_v0  ;;  %v4631_v0 = vld [vmem:[%s6345_s3 + $0x38] sm:$0xff] }
0x17e3   :  { %5084 = vmatprep.subr.mxu0 %v4628_v2  ;;  %v3554_v21 = vpop.permute.xlu0 %3553 }
0x17e5   :  { %v3134_v54 = vpop.f32.mrb[36].mxu1 }
0x17e6   :  { %v3135_v55 = vadd.f32 %v3134_v54, %v5693_v1  ;;  %v5093_v58 = vpop.f32.mrb[37].mxu1 }
0x17e7   :  { %v3474_v23 = vpop.permute.xlu0 %3473 }
0x17e8   :  { %v3216_v59 = vsel %vm213_vm2, %v3135_v55, -inf }
0x17e9   :  { %3217 = vmax.xlane.f32.xlu1 %v3216_v59  ;;  %v3212_v60 = vpop.f32.mrb[38].mxu1 }
0x17ea   :  { %v3213_v61 = vadd.f32 %v3212_v60, %v5683_v57  ;;  %v5098_v62 = vpop.f32.mrb[39].mxu1 }
0x17ec   :  { %v3219_v63 = vsel %vm213_vm2, %v3213_v61, -inf }
0x17ed   :  { %3220 = vmax.xlane.f32.xlu1 %v3219_v63 }
0x1876   :  { %v3218_v3 = vpop.xlane.xlu1 %3217 }
0x1877   :  { %v3222_v4 = vsub.f32 %v3135_v55, %v3218_v3 }
0x1879   :  { %v3224_v5 = vmul.f32 1.442695, %v3222_v4 }
0x187a   :  { %v3221_v6 = vpop.xlane.xlu1 %3220 }
0x187b   :  { %5458 = vpow2.f32 %v3224_v5  ;;  %v3223_v7 = vsub.f32 %v3213_v61, %v3221_v6  ;;  %v4664_v5 = vld [vmem:[%s6350_s8 + $0xb] ss:$0 sm:$0xff] }
0x187d   :  { %v3226_v8 = vmul.f32 1.442695, %v3223_v7 }
0x187f   :  { %5460 = vpow2.f32 %v3226_v8 }
0x1885   :  { %v5459_v10 = vpop.eup %5458 }
0x1886   :  { %v3228_v12 = vsel %vm213_vm2, %v5459_v10, 0.0 }
0x1887   :  { %3229 = vadd.xlane.f32.xlu1 %v3228_v12 }
0x1889   :  { %v5461_v13 = vpop.eup %5460 }
0x188a   :  { %v3231_v39 = vsel %vm213_vm2, %v5461_v13, 0.0 }
0x188b   :  { %3232 = vadd.xlane.f32.xlu1 %v3231_v39 }
0x189c   :  { %3238 = vrot.lane.b32.xlu1 %v5959_v34, %s5544_s17 }
0x18a0   :  { %3551 = vrot.lane.b32.xlu1 %v5957_v30, %s5546_s19 }
0x18b4   :  { %v2818_v14 = vpop.f32.mrb[20].mxu0 }
0x18b5   :  { %v5073_v15 = vpop.f32.mrb[21].mxu0  ;;  %5081 = vmatprep.mubr.msk.f32.mxu0 %vm213_vm2, %v2818_v14 }
0x18b6   :  { %5082 = vmatmul.mubr.msk.f32.vlgmr.msra.gmra.mrb[22].mxu0 %vm213_vm2, %v2894_v51 }
0x18b7   :  { %5086 = vmatprep.mubr.msk.f32.mxu0 %vm213_vm2, %v6015_v9  ;;  %5085 = vmatpush3.msra.mxu0 %v4628_v2 }
0x18b8   :  { %5099 = vmatprep.subr.mxu0 %v5534_v36 }
0x18be   :  { %5087 = vmatmul.mubr.msk.f32.vlgmr.msra.gmra.mrb[22].mxu0 %vm213_vm2, %v6017_v11 }
0x18bf   :  { %5101 = vmatprep.mubr.msk.f32.mxu0 %vm5535_vm1, %v5534_v36 }
0x1914   :  { %v3230_v16 = vpop.xlane.xlu1 %3229 }
0x1915   :  { %5462 = vrcp.f32 %v3230_v16 }
0x1918   :  { %v3233_v41 = vpop.xlane.xlu1 %3232 }
0x1919   :  { %5464 = vrcp.f32 %v3233_v41 }
0x191c   :  { %v3239_v18 = vpop.permute.xlu1 %3238 }
0x191d   :  { %5100 = vmatpush3.msra.mxu0 %v3239_v18 }
0x191e   :  { %5109 = vmatprep.subr.mxu0 %v4630_v17 }
0x191f   :  { %v5463_v9 = vpop.eup %5462 }
0x1920   :  { %v3236_v20 = vmul.f32 %v5463_v9, %v5459_v10  ;;  %v3552_v37 = vpop.permute.xlu1 %3551 }
0x1922   :  { %5102 = vmatmul.mubr.msk.f32.vlgmr.msra.gmra.mrb[24].mxu0 %vm213_vm2, %v3236_v20 }
0x1923   :  { %v5465_v11 = vpop.eup %5464  ;;  %5110 = vmatpush3.msra.mxu0 %v4630_v17 }
0x1924   :  { %v3237_v22 = vmul.f32 %v5465_v11, %v5461_v13  ;;  %5119 = vmatprep.subr.mxu0 %v5534_v36 }
0x1926   :  { %5107 = vmatmul.mubr.msk.f32.vlgmr.msra.gmra.mrb[40].mxu1 %vm213_vm2, %v3237_v22  ;;  %v4667_v22 = vld [vmem:[%s6346_s4 + $0x20] sm:$0xff] }
0x1927   :  { %5115 = vmatpush3.xpose.msk.msra.mxu1 %vm213_vm2, %v3476_v19  ;;  %5116 = vmatprep.mubr.msk.f32.mxu1 %vm5535_vm1, %v5534_v36 }
0x1928   :  { %5124 = vmatprep.subr.mxu1 %v5534_v36 }
0x192a   :  { %5117 = vmatmul.mubr.msk.f32.vlgmr.msra.gmra.mrb[42].mxu1 %vm213_vm2, %v3474_v23  ;;  %v4668_v23 = vld [vmem:[%s6346_s4 + $0x28] sm:$0xff] }
0x192b   :  { %5126 = vmatprep.mubr.msk.f32.mxu1 %vm5535_vm1, %v5534_v36 }
0x19f5   :  { %v3310_v24 = vpop.f32.mrb[24].mxu0 }
0x19f6   :  { %v5103_v28 = vpop.f32.mrb[25].mxu0  ;;  %5111 = vmatprep.mubr.msk.f32.mxu0 %vm213_vm2, %v3310_v24  ;;  %v5293_v24 = vpack.c.bf16 %v4668_v23, %v4667_v22 }
0x19f7   :  { %v4669_v28 = vld [vmem:[%s6346_s4 + $0x30] sm:$0xff] }
0x19f9   :  { %v3386_v29 = vpop.f32.mrb[40].mxu1 }
0x19fa   :  { %v5108_v31 = vpop.f32.mrb[41].mxu1  ;;  %5112 = vmatmul.mubr.msk.f32.vlgmr.msra.gmra.mrb[22].mxu0 %vm213_vm2, %v3386_v29  ;;  %v4670_v29 = vld [vmem:[%s6346_s4 + $0x38] sm:$0xff] }
0x19fb   :  { %5120 = vmatpush3.xpose.msk.msra.mxu0 %vm213_vm2, %v3554_v21  ;;  %5121 = vmatprep.mubr.msk.f32.mxu0 %vm5535_vm1, %v5534_v36  ;;  %v5297_v31 = vpack.c.bf16 %v4670_v29, %v4669_v28  ;;  %v4690_v29 = vld [vmem:[%s6350_s8 + $0xf] ss:$0 sm:$0xff] }
0x19fc   :  { %5129 = vmatprep.subr.mxu0 %v5534_v36 }
0x19fd   :  { %v3547_v38 = vpop.f32.mrb[42].mxu1 }
0x19fe   :  { %v3548_v40 = vadd.f32 %v3547_v38, %v5693_v1  ;;  %v5118_v32 = vpop.f32.mrb[43].mxu1  ;;  %5122 = vmatmul.mubr.msk.f32.vlgmr.msra.gmra.mrb[26].mxu0 %vm213_vm2, %v3552_v37  ;;  %v4674_v37 = vld [vmem:[%s6347_s5 + $0x80] sm:$0xff]  ;;  %v4675_v38 = vld [vmem:[%s6347_s5 + $0x88] sm:$0xff] }
0x19ff   :  { %5131 = vmatprep.mubr.msk.f32.mxu0 %vm5535_vm1, %v5534_v36  ;;  %v5301_v32 = vpack.c.bf16 %v4675_v38, %v4674_v37 }
0x1a00   :  { %v3629_v42 = vsel %vm213_vm2, %v3548_v40, -inf }
0x1a01   :  { %3630 = vmax.xlane.f32.xlu0 %v3629_v42  ;;  %v4677_v42 = vld [vmem:[%s6347_s5 + $0x98] sm:$0xff] }
0x1a8e   :  { %v3631_v26 = vpop.xlane.xlu0 %3630 }
0x1a8f   :  { %v3635_v43 = vsub.f32 %v3548_v40, %v3631_v26  ;;  %v4676_v40 = vld [vmem:[%s6347_s5 + $0x90] sm:$0xff] }
0x1a90   :  { %v5305_v26 = vpack.c.bf16 %v4677_v42, %v4676_v40 }
0x1a91   :  { %v3637_v44 = vmul.f32 1.442695, %v3635_v43  ;;  %v4678_v43 = vld [vmem:[%s6347_s5 + $0xa0] sm:$0xff] }
0x1a93   :  { %5466 = vpow2.f32 %v3637_v44  ;;  %v4679_v44 = vld [vmem:[%s6347_s5 + $0xa8] sm:$0xff] }
0x1a9d   :  { %v5467_v45 = vpop.eup %5466 }
0x1a9e   :  { %v3641_v46 = vsel %vm213_vm2, %v5467_v45, 0.0 }
0x1a9f   :  { %3642 = vadd.xlane.f32.xlu0 %v3641_v46 }
0x1ad1   :  { %v3625_v47 = vpop.f32.mrb[26].mxu0 }
0x1ad2   :  { %v3626_v1 = vadd.f32 %v3625_v47, %v5683_v57  ;;  %v5123_v48 = vpop.f32.mrb[27].mxu0 }
0x1ad4   :  { %v3632_v49 = vsel %vm213_vm2, %v3626_v1, -inf }
0x1ad5   :  { %3633 = vmax.xlane.f32.xlu1 %v3632_v49 }
0x1ae6   :  { %3727 = vrot.lane.b32.xlu1 %v5957_v30, %s5547_s26 }
0x1b2c   :  { %v3643_v57 = vpop.xlane.xlu0 %3642 }
0x1b62   :  { %v3634_v50 = vpop.xlane.xlu1 %3633 }
0x1b63   :  { %v3636_v51 = vsub.f32 %v3626_v1, %v3634_v50 }
0x1b65   :  { %v3639_v53 = vmul.f32 1.442695, %v3636_v51 }
0x1b66   :  { %v3728_v54 = vpop.permute.xlu1 %3727 }
0x1b67   :  { %5468 = vpow2.f32 %v3639_v53  ;;  %5130 = vmatpush3.msra.mxu0 %v3728_v54  ;;  %v4665_v53 = vld [vmem:[%s6350_s8 + $0xc] ss:$0 sm:$0xff] }
0x1b68   :  { %5470 = vrcp.f32 %v3643_v57  ;;  %5134 = vmatprep.subr.mxu0 %v4631_v0  ;;  %v4666_v57 = vld [vmem:[%s6350_s8 + $0xd] ss:$0 sm:$0xff] }
0x1b71   :  { %v5469_v55 = vpop.eup %5468 }
0x1b72   :  { %v3644_v58 = vsel %vm213_vm2, %v5469_v55, 0.0  ;;  %v5471_v60 = vpop.eup %5470 }
0x1b73   :  { %3645 = vadd.xlane.f32.xlu0 %v3644_v58  ;;  %v3649_v61 = vmul.f32 %v5471_v60, %v5467_v45  ;;  %v5309_v45 = vpack.c.bf16 %v4679_v44, %v4678_v43 }
0x1b89   :  { %3651 = vrot.lane.b32.xlu0 %v5959_v34, %s5547_s26 }
0x1c00   :  { %v3646_v59 = vpop.xlane.xlu0 %3645 }
0x1c01   :  { %5472 = vrcp.f32 %v3646_v59 }
0x1c04   :  { %v3652_v30 = vpop.permute.xlu0 %3651 }
0x1c05   :  { %5125 = vmatpush3.msra.mxu1 %v3652_v30 }
0x1c06   :  { %5127 = vmatmul.mubr.msk.f32.vlgmr.msra.gmra.mrb[44].mxu1 %vm213_vm2, %v3649_v61  ;;  %5294 = vmatprep.subr.bf16.mxu1 %v5293_v24 }
0x1c07   :  { %5296 = vmatpush3.bf16.msra.mxu1 %v5293_v24 }
0x1c08   :  { %5298 = vmatprep.subr.bf16.mxu1 %v5297_v31 }
0x1c0b   :  { %v5473_v62 = vpop.eup %5472  ;;  %5300 = vmatpush3.bf16.msra.mxu1 %v5297_v31 }
0x1c0c   :  { %v3650_v63 = vmul.f32 %v5473_v62, %v5469_v55  ;;  %v4680_v62 = vld [vmem:[%s6347_s5 + $0xb0] sm:$0xff] }
0x1c0e   :  { %5132 = vmatmul.mubr.msk.f32.vlgmr.msra.gmra.mrb[28].mxu0 %vm213_vm2, %v3650_v63  ;;  %v4681_v63 = vld [vmem:[%s6347_s5 + $0xb8] sm:$0xff] }
0x1c0f   :  { %5135 = vmatpush3.msra.mxu0 %v4631_v0  ;;  %v5313_v0 = vpack.c.bf16 %v4681_v63, %v4680_v62 }
0x1c10   :  { %5302 = vmatprep.subr.bf16.mxu0 %v5301_v32 }
0x1cd9   :  { %v3723_v34 = vpop.f32.mrb[44].mxu1 }
0x1cda   :  { %v5128_v2 = vpop.f32.mrb[45].mxu1  ;;  %5136 = vmatprep.mubr.msk.f32.mxu0 %vm213_vm2, %v3723_v34  ;;  %v4682_v34 = vld [vmem:[%s6347_s5 + $0xc0] sm:$0xff] }
0x1cdb   :  { %v4683_v2 = vld [vmem:[%s6347_s5 + $0xc8] sm:$0xff] }
0x1ce1   :  { %v3799_v3 = vpop.f32.mrb[28].mxu0 }
0x1ce2   :  { %v5133_v4 = vpop.f32.mrb[29].mxu0  ;;  %5137 = vmatmul.mubr.msk.f32.vlgmr.msra.gmra.mrb[22].mxu0 %vm213_vm2, %v3799_v3  ;;  %v5317_v3 = vpack.c.bf16 %v4683_v2, %v4682_v34 }
0x1ce3   :  { %5304 = vmatpush3.bf16.msra.mxu0 %v5301_v32  ;;  %v4684_v4 = vld [vmem:[%s6347_s5 + $0xd0] sm:$0xff] }
0x1ce4   :  { %5306 = vmatprep.subr.bf16.mxu0 %v5305_v26 }
0x1ce7   :  { %5308 = vmatpush3.bf16.msra.mxu0 %v5305_v26 }
0x1ce8   :  { %5310 = vmatprep.subr.bf16.mxu0 %v5309_v45 }
0x1ceb   :  { %5312 = vmatpush3.bf16.msra.mxu0 %v5309_v45 }
0x1cec   :  { %5314 = vmatprep.subr.bf16.mxu0 %v5313_v0 }
0x1cef   :  { %5316 = vmatpush3.bf16.msra.mxu0 %v5313_v0 }
0x1cf0   :  { %5318 = vmatprep.subr.bf16.mxu0 %v5317_v3 }
0x1cf3   :  { %5320 = vmatpush3.bf16.msra.mxu0 %v5317_v3 }
0x1db5   :  { %v5138_v6 = vpop.f32.mrb[22].mxu0 }
0x1db6   :  { %v3892_v7 = vadd.f32 %v5138_v6, %v4664_v5  ;;  %v3875_v8 = vpop.f32.mrb[23].mxu0 }
0x1db7   :  { %v3891_v10 = vadd.f32 %v4664_v5, %v3875_v8  ;;  %v4685_v5 = vld [vmem:[%s6347_s5 + $0xd8] sm:$0xff]  ;;  %v4687_v8 = vld [vmem:[%s6347_s5 + $0xe8] sm:$0xff] }
0x1db8   :  { %v3894_v12 = vadd.f32 %v3892_v7, %v5946_v27  ;;  %v5321_v6 = vpack.c.bf16 %v4685_v5, %v4684_v4  ;;  %v4686_v7 = vld [vmem:[%s6347_s5 + $0xe0] sm:$0xff]  ;;  %v4691_v4 = vld [vmem:[%s6350_s8 + $0x10] ss:$0 sm:$0xff] }
0x1db9   :  { %v3893_v13 = vadd.f32 %v3891_v10, %v5944_v25  ;;  %v5325_v10 = vpack.c.bf16 %v4687_v8, %v4686_v7  ;;  %v4692_v8 = vld [vmem:[%s6350_s8 + $0x11] ss:$0 sm:$0xff] }
0x1dba   :  { %v3900_v39 = vsel %vm66_vm0, %v3894_v12, 0.0  ;;  %5322 = vmatprep.subr.bf16.mxu0 %v5321_v6 }
0x1dbb   :  { %3901 = vadd.xlane.f32.xlu0 %v3900_v39  ;;  %v3897_v14 = vsel %vm66_vm0, %v3893_v13, 0.0  ;;  %5324 = vmatpush3.bf16.msra.mxu0 %v5321_v6 }
0x1dbc   :  { %3898 = vadd.xlane.f32.xlu1 %v3897_v14  ;;  %5326 = vmatprep.subr.bf16.mxu0 %v5325_v10  ;;  %v4671_v14 = vld [vmem:[%s6350_s8 + $0xe] ss:$0 sm:$0xff] }
0x1dbf   :  { %5328 = vmatpush3.bf16.msra.mxu0 %v5325_v10 }
0x1e48   :  { %v3902_v15 = vpop.xlane.xlu0 %3901 }
0x1e49   :  { %v3904_v16 = vmul.f32 0.03125, %v3902_v15  ;;  %v3899_v41 = vpop.xlane.xlu1 %3898 }
0x1e4a   :  { %v3903_v17 = vmul.f32 0.03125, %v3899_v41 }
0x1e4b   :  { %v3906_v18 = vsub.f32 %v3894_v12, %v3904_v16  ;;  %v4688_v12 = vld [vmem:[%s6347_s5 + $0xf0] sm:$0xff] }
0x1e4c   :  { %v3905_v19 = vsub.f32 %v3893_v13, %v3903_v17  ;;  %v4689_v13 = vld [vmem:[%s6347_s5 + $0xf8] sm:$0xff] }
0x1e4d   :  { %v3908_v9 = vmul.f32 %v3906_v18, %v3906_v18  ;;  %v5329_v39 = vpack.c.bf16 %v4689_v13, %v4688_v12  ;;  %v4180_v13 = vld [vmem:[%s6348_s6 + $0x20] sm:$0xff] }
0x1e4e   :  { %v3907_v20 = vmul.f32 %v3905_v19, %v3905_v19 }
0x1e4f   :  { %v3912_v11 = vsel %vm66_vm0, %v3908_v9, 0.0  ;;  %5330 = vmatprep.subr.bf16.mxu0 %v5329_v39 }
0x1e50   :  { %3913 = vadd.xlane.f32.xlu1 %v3912_v11  ;;  %v3909_v21 = vsel %vm66_vm0, %v3907_v20, 0.0  ;;  %5332 = vmatpush3.bf16.msra.mxu0 %v5329_v39  ;;  %v4181_v39 = vld [vmem:[%s6348_s6 + $0x28] sm:$0xff] }
0x1e51   :  { %3910 = vadd.xlane.f32.xlu0 %v3909_v21 }
0x1edd   :  { %v3914_v46 = vpop.xlane.xlu1 %3913 }
0x1ede   :  { %v3916_v47 = vmul.f32 0.03125, %v3914_v46  ;;  %v3911_v1 = vpop.xlane.xlu0 %3910 }
0x1edf   :  { %v3915_v48 = vmul.f32 0.03125, %v3911_v1 }
0x1ee0   :  { %v3918_v49 = vadd.f32 1e-12, %v3916_v47 }
0x1ee1   :  { %v3917_v50 = vadd.f32 1e-12, %v3915_v48 }
0x1ee2   :  { %5474 = vrsqrt.f32 %v3918_v49 }
0x1ee3   :  { %5476 = vrsqrt.f32 %v3917_v50 }
0x1eec   :  { %v5475_v51 = vpop.eup %5474 }
0x1eed   :  { %v5477_v54 = vpop.eup %5476  ;;  %v3922_v55 = vmul.f32 %v5475_v51, %v3906_v18 }
0x1eee   :  { %v3921_v58 = vmul.f32 %v5477_v54, %v3905_v19  ;;  %v4176_v54 = vld [vmem:[%s6348_s6] sm:$0xff] }
0x1eef   :  { %v3928_v59 = vmul.f32 %v4665_v53, %v3922_v55  ;;  %v4177_v55 = vld [vmem:[%s6348_s6 + $0x8] sm:$0xff] }
0x1ef0   :  { %v3927_v60 = vmul.f32 %v4665_v53, %v3921_v58  ;;  %v5334_v58 = vpack.c.bf16 %v4177_v55, %v4176_v54 }
0x1ef1   :  { %v3934_v30 = vadd.f32 %v4666_v57, %v3928_v59  ;;  %v4178_v59 = vld [vmem:[%s6348_s6 + $0x10] sm:$0xff] }
0x1ef2   :  { %v3933_v61 = vadd.f32 %v4666_v57, %v3927_v60  ;;  %v5548_v57 = vmov 0.0|0.0   ;;  %v4179_v60 = vld [vmem:[%s6348_s6 + $0x18] sm:$0xff] }
0x1ef3   :  { %5333 = vmatprep.subr.bf16.mxu1 %v5548_v57 }
0x1ef4   :  { %5147 = vmatprep.mubr.msk.f32.mxu1 %vm66_vm0, %v3933_v61 }
0x1ef5   :  { %5148 = vmatmul.mubr.msk.f32.vlgmr.msra.gmra.mrb[46].mxu1 %vm66_vm0, %v3934_v30 }
0x1ef6   :  { %5193 = vmatprep.mubr.msk.f32.mxu1 %vm5535_vm1, %v5534_v36  ;;  %5335 = vmatpush3.bf16.msra.mxu1 %v5334_v58 }
0x1ef7   :  { %5336 = vmatprep.subr.bf16.mxu1 %v5548_v57 }
0x1fc8   :  { %v5149_v15 = vpop.f32.mrb[46].mxu1 }
0x1fc9   :  { %v4023_v16 = vadd.f32 %v5149_v15, %v4671_v14  ;;  %v4017_v41 = vpop.f32.mrb[47].mxu1 }
0x1fca   :  { %v4018_v17 = vadd.f32 %v4671_v14, %v4017_v41  ;;  %v5340_v41 = vpack.c.bf16 %v4181_v39, %v4180_v13 }
0x1fcb   :  { %v4029_v18 = vmul.f32 0.70710677, %v4023_v16  ;;  %v4027_v23 = vmul.f32 0.5, %v4023_v16 }
0x1fcc   :  { %v4028_v19 = vmul.f32 0.70710677, %v4018_v17  ;;  %v4026_v21 = vmul.f32 0.5, %v4018_v17  ;;  %v4182_v17 = vld [vmem:[%s6348_s6 + $0x30] sm:$0xff] }
0x1fcd   :  { %5478 = verf.f32 %v4029_v18  ;;  %v4183_v18 = vld [vmem:[%s6348_s6 + $0x38] sm:$0xff] }
0x1fce   :  { %5480 = verf.f32 %v4028_v19 }
0x1fd7   :  { %v5479_v9 = vpop.eup %5478 }
0x1fd8   :  { %v5481_v20 = vpop.eup %5480  ;;  %v4033_v11 = vadd.f32 1.0, %v5479_v9  ;;  %v5343_v9 = vpack.c.bf16 %v4183_v18, %v4182_v17 }
0x1fd9   :  { %v4032_v22 = vadd.f32 1.0, %v5481_v20  ;;  %v4184_v20 = vld [vmem:[%s6348_s6 + $0x40] sm:$0xff] }
0x1fda   :  { %v4035_v28 = vmul.f32 %v4033_v11, %v4027_v23  ;;  %v4185_v11 = vld [vmem:[%s6348_s6 + $0x48] sm:$0xff]  ;;  %v4186_v23 = vld [vmem:[%s6348_s6 + $0x50] sm:$0xff] }
0x1fdb   :  { %v4034_v24 = vmul.f32 %v4032_v22, %v4026_v21  ;;  %v4304_v21 = vrot.slane %v5946_v27, 7  ;;  %v5346_v22 = vpack.c.bf16 %v4185_v11, %v4184_v20  ;;  %v4456_v27 = vld [vmem:[%s6349_s7] sm:$0xff] }
0x1fdd   :  { %5182 = vmatprep.mubr.f32.mxu0 %v4034_v24  ;;  %v4187_v24 = vld [vmem:[%s6348_s6 + $0x58] sm:$0xff] }
0x1fde   :  { %5183 = vmatmul.mubr.f32.vlgmr.msra.gmra.mrb[30].mxu0 %v4035_v28  ;;  %v4305_v28 = vsel %vm4230_vm3, %v4304_v21, %v5944_v25 }
0x20b1   :  { %v5184_v31 = vpop.f32.mrb[30].mxu0 }
0x20b2   :  { %v4130_v37 = vadd.f32 %v5184_v31, %v4690_v29  ;;  %v4124_v38 = vpop.f32.mrb[31].mxu0  ;;  %v4457_v31 = vld [vmem:[%s6349_s7 + $0x8] sm:$0xff] }
0x20b3   :  { %v4125_v40 = vadd.f32 %v4690_v29, %v4124_v38  ;;  %v5349_v29 = vpack.c.bf16 %v4187_v24, %v4186_v23  ;;  %v5352_v25 = vpack.c.bf16 %v4457_v31, %v4456_v27  ;;  %v4458_v38 = vld [vmem:[%s6349_s7 + $0x10] sm:$0xff] }
0x20b4   :  { %v4134_v32 = vadd.f32 %v4130_v37, %v3934_v30  ;;  %v4378_v37 = vrot.slane %v5640_v35, 7  ;;  %v4460_v35 = vld [vmem:[%s6349_s7 + $0x20] sm:$0xff] }
0x20b5   :  { %v4133_v42 = vadd.f32 %v4125_v40, %v3933_v61  ;;  %v5337_v61 = vpack.c.bf16 %v4179_v60, %v4178_v59  ;;  %v4459_v40 = vld [vmem:[%s6349_s7 + $0x18] sm:$0xff] }
0x20b6   :  { %v4140_v26 = vsel %vm66_vm0, %v4134_v32, 0.0 }
0x20b7   :  { %4141 = vadd.xlane.f32.xlu0 %v4140_v26  ;;  %v4137_v43 = vsel %vm66_vm0, %v4133_v42, 0.0  ;;  %5338 = vmatpush3.bf16.msra.mxu1 %v5337_v61  ;;  %v4461_v26 = vld [vmem:[%s6349_s7 + $0x28] sm:$0xff] }
0x20b8   :  { %4138 = vadd.xlane.f32.xlu1 %v4137_v43  ;;  %5339 = vmatprep.subr.bf16.mxu1 %v5548_v57  ;;  %v5358_v43 = vpack.c.bf16 %v4461_v26, %v4460_v35 }
0x2144   :  { %v4142_v44 = vpop.xlane.xlu0 %4141 }
0x2145   :  { %v4144_v45 = vmul.f32 0.03125, %v4142_v44  ;;  %v4139_v46 = vpop.xlane.xlu1 %4138 }
0x2146   :  { %v4143_v47 = vmul.f32 0.03125, %v4139_v46 }
0x2147   :  { %v4146_v1 = vsub.f32 %v4134_v32, %v4144_v45  ;;  %v4379_v32 = vsel %vm4230_vm3, %v4378_v37, %v5636_v33  ;;  %v4462_v33 = vld [vmem:[%s6349_s7 + $0x30] sm:$0xff]  ;;  %v4693_v45 = vld.sshfl [vmem:[%s6350_s8 + $0x18] sm:$0x13 pattern:$0x75316420] }
0x2148   :  { %v4145_v48 = vsub.f32 %v4133_v42, %v4143_v47  ;;  %v5355_v42 = vpack.c.bf16 %v4459_v40, %v4458_v38  ;;  %v4203_v46 = vrot.slane %v4693_v45, %v5676_v52 }
0x2149   :  { %v4148_v49 = vmul.f32 %v4146_v1, %v4146_v1 }
0x214a   :  { %v4147_v50 = vmul.f32 %v4145_v48, %v4145_v48  ;;  %v4215_v47 = vrot.slane %v4203_v46, %v5680_v56 }
0x214b   :  { %v4152_v51 = vsel %vm66_vm0, %v4148_v49, 0.0 }
0x214c   :  { %4153 = vadd.xlane.f32.xlu0 %v4152_v51  ;;  %v4149_v53 = vsel %vm66_vm0, %v4147_v50, 0.0 }
0x214d   :  { %4150 = vadd.xlane.f32.xlu1 %v4149_v53 }
0x21d9   :  { %v4154_v30 = vpop.xlane.xlu0 %4153 }
0x21da   :  { %v4156_v62 = vmul.f32 0.03125, %v4154_v30  ;;  %v4151_v63 = vpop.xlane.xlu1 %4150 }
0x21db   :  { %v4155_v0 = vmul.f32 0.03125, %v4151_v63 }
0x21dc   :  { %v4158_v34 = vadd.f32 1e-12, %v4156_v62 }
0x21dd   :  { %v4157_v2 = vadd.f32 1e-12, %v4155_v0 }
0x21de   :  { %5482 = vrsqrt.f32 %v4158_v34 }
0x21df   :  { %5484 = vrsqrt.f32 %v4157_v2 }
0x21e8   :  { %v5483_v3 = vpop.eup %5482 }
0x21e9   :  { %v5485_v5 = vpop.eup %5484  ;;  %v4162_v6 = vmul.f32 %v5483_v3, %v4146_v1  ;;  %v4196_v1 = vcombine.high %v4693_v45, %v4693_v45 }
0x21ea   :  { %v4161_v7 = vmul.f32 %v5485_v5, %v4145_v48 }
0x21eb   :  { %v4168_v10 = vmul.f32 %v4691_v4, %v4162_v6  ;;  %v4210_v51 = vrot.slane %v4196_v1, %v5676_v52 }
0x21ec   :  { %v4167_v12 = vmul.f32 %v4691_v4, %v4161_v7 }
0x21ed   :  { %v4174_v14 = vadd.f32 %v4692_v8, %v4168_v10  ;;  %v4219_v53 = vrot.slane %v4210_v51, %v5680_v56 }
0x21ee   :  { %v4173_v15 = vadd.f32 %v4692_v8, %v4167_v12 }
0x21ef   :  { %v4229_v16 = vrot.slane %v4174_v14, 7 }
0x21f1   :  { %v4231_v19 = vsel %vm4230_vm3, %v4229_v16, %v4173_v15 }
0x21f2   :  { %5194 = vmatmul.mubr.msk.f32.vlgmr.msra.gmra.mrb[48].mxu1 %vm66_vm0, %v4231_v19 }
0x21f3   :  { %5341 = vmatpush3.bf16.msra.mxu1 %v5340_v41  ;;  %5204 = vmatprep.mubr.msk.f32.mxu1 %vm5535_vm1, %v5534_v36 }
0x21f4   :  { %5342 = vmatprep.subr.bf16.mxu1 %v5548_v57 }
0x21f7   :  { %5344 = vmatpush3.bf16.msra.mxu1 %v5343_v9 }
0x21f8   :  { %5345 = vmatprep.subr.bf16.mxu1 %v5548_v57 }
0x21fa   :  { %5205 = vmatmul.mubr.msk.f32.vlgmr.msra.gmra.mrb[50].mxu1 %vm66_vm0, %v4305_v28 }
0x21fb   :  { %5347 = vmatpush3.bf16.msra.mxu1 %v5346_v22  ;;  %5215 = vmatprep.mubr.msk.f32.mxu1 %vm5535_vm1, %v5534_v36 }
0x21fc   :  { %5348 = vmatprep.subr.bf16.mxu1 %v5548_v57 }
0x21ff   :  { %5350 = vmatpush3.bf16.msra.mxu1 %v5349_v29 }
0x2200   :  { %5351 = vmatprep.subr.bf16.mxu1 %v5548_v57 }
0x2202   :  { %5216 = vmatmul.mubr.msk.f32.vlgmr.msra.gmra.mrb[52].mxu1 %vm66_vm0, %v4379_v32 }
0x2203   :  { %5353 = vmatpush3.bf16.msra.mxu1 %v5352_v25  ;;  %5234 = vmatprep.mubr.msk.f32.mxu1 %vm5535_vm1, %v5534_v36  ;;  %v4463_v36 = vld [vmem:[%s6349_s7 + $0x38] sm:$0xff]  ;;  %s5549_s7 = smov [#allocation2]  }
0x2204   :  { %5354 = vmatprep.subr.bf16.mxu1 %v5548_v57  ;;  %v5361_v44 = vpack.c.bf16 %v4463_v36, %v4462_v33  ;;  %s4550_s1 = sshll.u32 %s5549_s7, 4  ;;  %s4551_s1 = int_to_ptr.vmem [resolvable:$true] %s4550_s1 }
0x2205   :  { %s5486_s13 = scalar_lea.vmem %s4551_s1, 96  ;;  %p5491_p1 = scmp.lt.s32.totalorder %s4551_s1, %s4551_s1 }
0x2206   :  { %p5487_p0 = scmp.ne.s32.totalorder %s4551_s1, %s5486_s13  ;;  %p5492_p2 = scmp.lt.s32.totalorder %s5486_s13, %s5486_s13 }
0x2207   :  { %5356 = vmatpush3.bf16.msra.mxu1 %v5355_v42 }
0x2208   :  { %5357 = vmatprep.subr.bf16.mxu1 %v5548_v57  ;;  %p5493_p3 = por %p5492_p2, %p5491_p1 }
0x220a   :  { %p5494_p4 = pnand %p5493_p3, %p5487_p0 }
0x220b   :  { %5359 = vmatpush3.bf16.msra.mxu1 %v5358_v43 }
0x220c   :  { %5360 = vmatprep.subr.bf16.mxu1 %v5548_v57  ;;  %v4211_v57 = vcombine.high %v4203_v46, %v4203_v46 }
0x220e   :  { %v4223_v59 = vrot.slane %v4211_v57, %v5680_v56 }
0x220f   :  { %5362 = vmatpush3.bf16.msra.mxu1 %v5361_v44 }
0x22c5   :  { %v4300_v48 = vpop.f32.mrb[48].mxu1 }
0x22c6   :  { %v4301_v49 = vadd.f32 %v4300_v48, %v4215_v47  ;;  %v5195_v50 = vpop.f32.mrb[49].mxu1 }
0x22c8   :  { %4453 = vst.msk [vmem:[#allocation2] sm:$0x3] %vm4452_vm4, %v4301_v49  ;;  %5235 = vmatmul.mubr.msk.f32.vlgmr.msra.gmra.mrb[54].mxu1 %vm4469_vm5, %v4301_v49 }
0x22cd   :  { %v4374_v54 = vpop.f32.mrb[50].mxu1 }
0x22ce   :  { %v4375_v55 = vadd.f32 %v4374_v54, %v4219_v53  ;;  %v5206_v58 = vpop.f32.mrb[51].mxu1 }
0x22d0   :  { %4454 = vst.msk [vmem:[#allocation2 + $0x2] sm:$0x3] %vm4452_vm4, %v4375_v55 }
0x22d5   :  { %v4448_v60 = vpop.f32.mrb[52].mxu1 }
0x22d6   :  { %v4449_v61 = vadd.f32 %v4448_v60, %v4223_v59  ;;  %v5217_v30 = vpop.f32.mrb[53].mxu1 }
0x22d8   :  { %4455 = vst.msk [vmem:[#allocation2 + $0x4] sm:$0x3] %vm4452_vm4, %v4449_v61 }
0x22d9   :  { %5497 = shalt.err (!%p5494_p4)
}
0x22da   :  { %s5498_s16 = scalar_lea.hbm %s6351_s9, 96 }
0x22db   :  { %p5499_p5 = scmp.ne.s32.totalorder %s6351_s9, %s5498_s16  ;;  %p5502_p6 = scmp.lt.u32.totalorder %s5498_s16, %s6351_s9 }
0x22dd   :  { %p5504_p7 = pnand %p5502_p6, %p5499_p5 }
0x22df   :  { %5507 = shalt.err (!%p5504_p7)
}
0x22e0   :  { %s5550_s19 = smov 32   ;;  %s5551_s3 = smov 2   ;;  %v4697_v52 = vld [vmem:[%s6350_s8 + $0x1b] ss:$0 sm:$0xff]  ;;  %vm4543_vm6 = vcmask 17408  }
0x22e1   :  { %4556 = dma.vmem_to_hbm [thread:$0]  %s4551_s1, 96, %s6351_s9, [#allocation3], %s5550_s19, %s5550_s19, %s5551_s3  }
0x22e2   :  { %s5552_s28 = smov [#allocation4]  }
0x22e3   :  { %s4563_s29 = sshll.u32 %s5552_s28, 4  ;;  %s4564_s29 = int_to_ptr.vmem [resolvable:$true] %s4563_s29 }
0x22e4   :  { %s5508_s11 = scalar_lea.vmem %s4564_s29, 32  ;;  %p5513_p9 = scmp.lt.s32.totalorder %s4564_s29, %s4564_s29 }
0x22e5   :  { %p5509_p8 = scmp.ne.s32.totalorder %s4564_s29, %s5508_s11  ;;  %p5514_p10 = scmp.lt.s32.totalorder %s5508_s11, %s5508_s11 }
0x22e7   :  { %p5515_p11 = por %p5514_p10, %p5513_p9 }
0x22e9   :  { %p5516_p12 = pnand %p5515_p11, %p5509_p8 }
0x239b   :  { %v4539_v56 = vpop.f32.mrb[54].mxu1 }
0x239c   :  { %v4540_v62 = vadd.f32 %v4697_v52, %v4539_v56  ;;  %v5236_v63 = vpop.f32.mrb[55].mxu1 }
0x239e   :  { %4544 = vst.msk [vmem:[#allocation4] sm:$0x3] %vm4543_vm6, %v4540_v62 }
0x239f   :  { %5519 = shalt.err (!%p5516_p12)
}
0x23a0   :  { %s5520_s20 = scalar_lea.hbm %s6352_s10, 32 }
0x23a1   :  { %p5521_p13 = scmp.ne.s32.totalorder %s6352_s10, %s5520_s20  ;;  %p5524_p0 = scmp.lt.u32.totalorder %s5520_s20, %s6352_s10 }
0x23a3   :  { %p5526_p1 = pnand %p5524_p0, %p5521_p13 }
0x23a5   :  { %5529 = shalt.err (!%p5526_p1)
}
0x23a6   :  { %4566 = dma.vmem_to_hbm [thread:$0]  %s4564_s29, 32, %s6352_s10, [#allocation5]  }
0x23a7   :  { %5530 = dma.done.wait [#allocation3], 96  }
0x23a8   :  { %5531 = vsyncadd [#allocation3], 4294967200 }
0x23a9   :  { %5532 = dma.done.wait [#allocation5], 32  }
0x23aa   :  { %5533 = vsyncadd [#allocation5], 4294967264 }
0x23ab   :  { %4573 = vsyncpa [#allocation3], 1 }
0x23ac   :  { %4574 = vsyncpa [#allocation5], 1 }

</bundles_post_ra>
